<compile_context>
chip_gen: v6e
topology: v6e:2x2x1
jax: 0.10.0
libtpu: 0.0.40
codegen_flags: <defaults>
</compile_context>

<pallas_src>
import math

import jax
import jax.numpy as jnp
from jax.experimental import pallas as pl
from jax.experimental.pallas import tpu as pltpu

LANE = 128  # TPU lane width: output-channel dims are padded to a multiple of this


def _ceil_to(x, m):
    return (x + m - 1) // m * m


# ---------------------------------------------------------------------------
# In-kernel conv helpers.  Weights are (3, Cin, Cout) bf16 with eval-mode BN
# folded in; each conv is three accumulating MXU dots (one per tap), f32 acc.
# ---------------------------------------------------------------------------
def _conv3_stride1(h, w_ref, b_ref):
    """3-tap conv, stride 1, padding 1.  h: (L, Cin) f32 value."""
    l, c = h.shape
    z = jnp.zeros((1, c), h.dtype)
    t0 = jnp.concatenate([z, h[: l - 1]], axis=0).astype(jnp.bfloat16)   # x[t-1]
    t1 = h.astype(jnp.bfloat16)                                          # x[t]
    t2 = jnp.concatenate([h[1:], z], axis=0).astype(jnp.bfloat16)        # x[t+1]
    acc = jnp.dot(t0, w_ref[0], preferred_element_type=jnp.float32)
    acc = acc + jnp.dot(t1, w_ref[1], preferred_element_type=jnp.float32)
    acc = acc + jnp.dot(t2, w_ref[2], preferred_element_type=jnp.float32)
    return acc + b_ref[...]


def _conv3_strided(pad_ref, h, w_ref, b_ref, stride):
    """3-tap conv, stride>1, padding 1, via an f32 halo scratch + strided reads.

    Returns (conv_out_f32, tap1_bf16); tap1 (rows x[t*stride]) is exactly the
    input the 1x1 stride-s downsample needs, so the caller reuses it.
    """
    l_in, c = h.shape
    l_out = (l_in - 1) // stride + 1
    pad_ref[0:1, :] = jnp.zeros((1, c), jnp.float32)                 # halo row
    pad_ref[l_in + 1:l_in + 2, :] = jnp.zeros((1, c), jnp.float32)   # halo row
    pad_ref[1:l_in + 1, :] = h
    taps = [pad_ref[pl.ds(k, l_out, stride=stride), :].astype(jnp.bfloat16)
            for k in range(3)]
    # TODO(synk): on v5e a one-pass even/odd deinterleave of `h` would turn the
    # three strided sublane reads into contiguous slices.
    acc = jnp.dot(taps[0], w_ref[0], preferred_element_type=jnp.float32)
    acc = acc + jnp.dot(taps[1], w_ref[1], preferred_element_type=jnp.float32)
    acc = acc + jnp.dot(taps[2], w_ref[2], preferred_element_type=jnp.float32)
    return acc + b_ref[...], taps[1]


# ---------------------------------------------------------------------------
# Whole-network fused kernel: stem + all BasicBlocks + global average pool.
# ---------------------------------------------------------------------------
def _make_resnet_kernel(block_meta):
    n_scratch = sum(1 for m in block_meta if m["stride"] != 1)

    def kernel(*refs):
        n = len(refs)
        scratches = list(refs[n - n_scratch:]) if n_scratch else []
        o_ref = refs[n - n_scratch - 1]
        it = iter(refs[: n - n_scratch - 1])
        x_ref, w0, b0 = next(it), next(it), next(it)
        blk_refs = []
        for m in block_meta:
            r = {"w1": next(it), "b1": next(it), "w2": next(it), "b2": next(it)}
            if m["has_ds"]:
                r["wd"], r["bd"] = next(it), next(it)
            blk_refs.append(r)

        # stem: conv3(s=1, pad=1) + folded BN + ReLU
        h = jnp.maximum(_conv3_stride1(x_ref[0], w0, b0), 0.0)

        pad_i = 0
        for m, r in zip(block_meta, blk_refs):
            s = m["stride"]
            ds_in = None
            if s == 1:
                a1 = _conv3_stride1(h, r["w1"], r["b1"])
            else:
                a1, ds_in = _conv3_strided(scratches[pad_i], h, r["w1"], r["b1"], s)
                pad_i += 1
            a1 = jnp.maximum(a1, 0.0)                       # conv1 + bn1 + relu
            a2 = _conv3_stride1(a1, r["w2"], r["b2"])       # conv2 + bn2
            if m["has_ds"]:                                 # 1x1 conv + bn residual
                if ds_in is None:
                    ds_in = h.astype(jnp.bfloat16)
                res = jnp.dot(ds_in, r["wd"][...],
                              preferred_element_type=jnp.float32) + r["bd"][...]
            else:
                res = h                                     # identity residual (f32)
            h = jnp.maximum(a2 + res, 0.0)

        # fused AvgPool1d whose window equals the remaining length
        o_ref[0] = jnp.mean(h, axis=0, keepdims=True).astype(o_ref.dtype)

    return kernel


def fused_resnet(x_nlc, prepared):
    """x_nlc: (N, L, embed) f32.  Returns (N, 1, co_pad) f32 pooled features."""
    n, l, embed = x_nlc.shape
    stem_w, stem_b = prepared["conv1_w"], prepared["conv1_b"]

    inputs = [x_nlc, stem_w, stem_b]
    in_specs = [
        pl.BlockSpec((1, l, embed), lambda i: (i, 0, 0)),
        pl.BlockSpec(stem_w.shape, lambda i: (0, 0, 0)),
        pl.BlockSpec(stem_b.shape, lambda i: (0, 0)),
    ]
    block_meta, scratch_shapes = [], []
    l_cur, co_pad = l, stem_w.shape[2]
    for blocks in prepared["layers"]:
        for blk in blocks:
            s = blk["stride"]
            block_meta.append({"stride": s, "has_ds": "wd" in blk})
            inputs += [blk["w1"], blk["b1"], blk["w2"], blk["b2"]]
            in_specs += [
                pl.BlockSpec(blk["w1"].shape, lambda i: (0, 0, 0)),
                pl.BlockSpec(blk["b1"].shape, lambda i: (0, 0)),
                pl.BlockSpec(blk["w2"].shape, lambda i: (0, 0, 0)),
                pl.BlockSpec(blk["b2"].shape, lambda i: (0, 0)),
            ]
            if "wd" in blk:
                inputs += [blk["wd"], blk["bd"]]
                in_specs += [
                    pl.BlockSpec(blk["wd"].shape, lambda i: (0, 0)),
                    pl.BlockSpec(blk["bd"].shape, lambda i: (0, 0)),
                ]
            if s != 1:  # f32 halo scratch for the strided conv's tap reads
                scratch_shapes.append(
                    pltpu.VMEM((l_cur + 2, blk["w1"].shape[1]), jnp.float32))
            l_cur = (l_cur - 1) // s + 1
            co_pad = blk["w2"].shape[2]

    return pl.pallas_call(
        _make_resnet_kernel(block_meta),
        out_shape=jax.ShapeDtypeStruct((n, 1, co_pad), jnp.float32),
        grid=(n,),
        in_specs=in_specs,
        out_specs=pl.BlockSpec((1, 1, co_pad), lambda i: (i, 0, 0)),
        scratch_shapes=scratch_shapes,
        compiler_params=pltpu.CompilerParams(dimension_semantics=("parallel",)),
    )(*inputs)


# ---------------------------------------------------------------------------
# Parameter construction (mirrors the module's __init__) and offline prep:
# fold eval-mode BatchNorm into the weights, pad OUTPUT channels to 128 lanes,
# keep weights in (K, Cin, Cout) tap layout, cast to bf16.
# ---------------------------------------------------------------------------
def init_params(key, layers, embed_size, conv_fn):
    def conv_w(k, K, cin, cout):
        std = math.sqrt(2.0 / (cout * K))   # kaiming_normal_, fan_out, relu
        return std * jax.random.normal(k, (K, cin, cout), jnp.float32)

    def bn(c):
        return (jnp.ones((c,), jnp.float32), jnp.zeros((c,), jnp.float32),
                jnp.zeros((c,), jnp.float32), jnp.ones((c,), jnp.float32))

    keys = iter(jax.random.split(key, 128))
    params = {"conv1_w": conv_w(next(keys), 3, embed_size, conv_fn),
              "bn1": bn(conv_fn), "layers": []}
    inplanes = conv_fn
    for idx, nblocks in enumerate(layers):
        planes = conv_fn * 2 ** idx
        first_stride = 1 if idx == 0 else 2
        blocks = []
        for b in range(nblocks):
            s = first_stride if b == 0 else 1
            blk = {"w1": conv_w(next(keys), 3, inplanes, planes), "bn1": bn(planes),
                   "w2": conv_w(next(keys), 3, planes, planes), "bn2": bn(planes),
                   "stride": s}
            if s != 1 or inplanes != planes:            # BasicBlock expansion == 1
                blk["ds_w"] = conv_w(next(keys), 1, inplanes, planes)
                blk["ds_bn"] = bn(planes)
            blocks.append(blk)
            inplanes = planes
        params["layers"].append(blocks)
    return params


def _fold_conv_bn(w, bn, cin_pad, cout_pad, eps=1e-5):
    """(K,Cin,Cout) conv + eval-mode BN -> (K,cin_pad,cout_pad) bf16, (1,cout_pad) f32."""
    gamma, beta, rm, rv = bn
    K, cin, cout = w.shape
    inv = gamma / jnp.sqrt(rv + eps)
    w_f = w * inv[None, None, :]
    bias = beta - rm * inv
    w_p = jnp.zeros((K, cin_pad, cout_pad), jnp.float32).at[:, :cin, :cout].set(w_f)
    b_p = jnp.zeros((1, cout_pad), jnp.float32).at[0, :cout].set(bias)
    return w_p.astype(jnp.bfloat16), b_p


def prepare_params(params, embed_size, conv_fn):
    c1_pad = _ceil_to(conv_fn, LANE)
    prepared = {}
    # stem keeps the real embed_size on its contraction axis (no input lane pad)
    prepared["conv1_w"], prepared["conv1_b"] = _fold_conv_bn(
        params["conv1_w"], params["bn1"], embed_size, c1_pad)
    prepared["layers"] = []
    cin_pad, cin = c1_pad, conv_fn
    for idx, blocks in enumerate(params["layers"]):
        planes = conv_fn * 2 ** idx
        cpl_pad = _ceil_to(planes, LANE)
        pblocks = []
        for blk in blocks:
            pb = {"stride": blk["stride"]}
            pb["w1"], pb["b1"] = _fold_conv_bn(blk["w1"], blk["bn1"], cin_pad, cpl_pad)
            pb["w2"], pb["b2"] = _fold_conv_bn(blk["w2"], blk["bn2"], cpl_pad, cpl_pad)
            if "ds_w" in blk:
                wd, bd = _fold_conv_bn(blk["ds_w"], blk["ds_bn"], cin_pad, cpl_pad)
                pb["wd"] = wd.reshape(cin_pad, cpl_pad)
                pb["bd"] = bd
            pblocks.append(pb)
            cin_pad, cin = cpl_pad, planes
        prepared["layers"].append(pblocks)
    prepared["c_out"] = cin
    return prepared


# ---------------------------------------------------------------------------
# Forward pass (PyTorch NCL input -> (N, C_out) features).
# BatchNorm uses inference (eval-mode) running statistics, folded into weights.
# ---------------------------------------------------------------------------
def resnet_forward(prepared, x_ncl, seq_len, n_layers):
    n, embed, l = x_ncl.shape
    x = jnp.transpose(x_ncl, (0, 2, 1)).astype(jnp.float32)   # NCL -> NLC (channels on lanes)

    # the fused avg-pool assumes its window equals the final conv length
    to_divide = 2 ** (n_layers - 1)
    k_pool = (seq_len + to_divide - 1) // to_divide
    l_cur = l
    for blocks in prepared["layers"]:
        for blk in blocks:
            l_cur = (l_cur - 1) // blk["stride"] + 1
    # TODO(synk): general AvgPool1d (window < final length -> multi-position pool)
    # is not implemented; this model configuration always hits the fused case.
    assert l_cur == k_pool, (l_cur, k_pool)

    pooled = fused_resnet(x, prepared)            # (N, 1, co_pad) f32
    return pooled[:, 0, :prepared["c_out"]]       # drop lane padding


if __name__ == "__main__":
    # ResNet(BasicBlock, [1, 1], seq_len=16, conv_fn=16, embed_size=8)
    # applied to x of shape (2, 8, 16)  (N, C_in, L).
    layers = [1, 1]
    batch, embed_size, conv_fn, seq_len = 2, 8, 16, 16

    key = jax.random.PRNGKey(0)
    pkey, xkey = jax.random.split(key)
    params = init_params(pkey, layers, embed_size, conv_fn)
    prepared = prepare_params(params, embed_size, conv_fn)
    x = jax.random.normal(xkey, (batch, embed_size, seq_len), jnp.float32)

    fwd = jax.jit(lambda inp: resnet_forward(prepared, inp, seq_len, len(layers)))
    out = jax.block_until_ready(fwd(x))

    assert out.shape == (batch, conv_fn * 2 ** (len(layers) - 1)), out.shape
    assert bool(jnp.all(jnp.isfinite(out)))
    print("KERNEL_OK")
</pallas_src>

<mosaic_0001>
module attributes {stable_mosaic.version = 11 : i64} {
  func.func @kernel(%arg0: i32, %arg1: memref<1x16x8xf32, #tpu.memory_space<vmem>>, %arg2: memref<3x8x128xbf16, #tpu.memory_space<vmem>>, %arg3: memref<1x128xf32, #tpu.memory_space<vmem>>, %arg4: memref<3x128x128xbf16, #tpu.memory_space<vmem>>, %arg5: memref<1x128xf32, #tpu.memory_space<vmem>>, %arg6: memref<3x128x128xbf16, #tpu.memory_space<vmem>>, %arg7: memref<1x128xf32, #tpu.memory_space<vmem>>, %arg8: memref<3x128x128xbf16, #tpu.memory_space<vmem>>, %arg9: memref<1x128xf32, #tpu.memory_space<vmem>>, %arg10: memref<3x128x128xbf16, #tpu.memory_space<vmem>>, %arg11: memref<1x128xf32, #tpu.memory_space<vmem>>, %arg12: memref<128x128xbf16, #tpu.memory_space<vmem>>, %arg13: memref<1x128xf32, #tpu.memory_space<vmem>>, %arg14: memref<1x1x128xf32, #tpu.memory_space<vmem>>, %arg15: memref<18x128xf32, #tpu.memory_space<vmem>>) attributes {dimension_semantics = [#tpu.dimension_semantics<parallel>], iteration_bounds = array<i64: 2>, scalar_prefetch = 0 : i64, scratch_operands = 1 : i64, tpu.core_type = #tpu.core_type<tc>, window_params = [{transform_indices = @transform_0, window_bounds = array<i64: 1, 16, 8>}, {pipeline_mode = #tpu.pipeline_mode<synchronous>, transform_indices = @transform_1, window_bounds = array<i64: 3, 8, 128>}, {pipeline_mode = #tpu.pipeline_mode<synchronous>, transform_indices = @transform_2, window_bounds = array<i64: 1, 128>}, {pipeline_mode = #tpu.pipeline_mode<synchronous>, transform_indices = @transform_3, window_bounds = array<i64: 3, 128, 128>}, {pipeline_mode = #tpu.pipeline_mode<synchronous>, transform_indices = @transform_4, window_bounds = array<i64: 1, 128>}, {pipeline_mode = #tpu.pipeline_mode<synchronous>, transform_indices = @transform_5, window_bounds = array<i64: 3, 128, 128>}, {pipeline_mode = #tpu.pipeline_mode<synchronous>, transform_indices = @transform_6, window_bounds = array<i64: 1, 128>}, {pipeline_mode = #tpu.pipeline_mode<synchronous>, transform_indices = @transform_7, window_bounds = array<i64: 3, 128, 128>}, {pipeline_mode = #tpu.pipeline_mode<synchronous>, transform_indices = @transform_8, window_bounds = array<i64: 1, 128>}, {pipeline_mode = #tpu.pipeline_mode<synchronous>, transform_indices = @transform_9, window_bounds = array<i64: 3, 128, 128>}, {pipeline_mode = #tpu.pipeline_mode<synchronous>, transform_indices = @transform_10, window_bounds = array<i64: 1, 128>}, {pipeline_mode = #tpu.pipeline_mode<synchronous>, transform_indices = @transform_11, window_bounds = array<i64: 128, 128>}, {pipeline_mode = #tpu.pipeline_mode<synchronous>, transform_indices = @transform_12, window_bounds = array<i64: 1, 128>}, {transform_indices = @transform_13, window_bounds = array<i64: 1, 1, 128>}]} {
    %c0 = arith.constant 0 : index
    %c0_0 = arith.constant 0 : index
    %c0_1 = arith.constant 0 : index
    %0 = vector.load %arg1[%c0, %c0_0, %c0_1] : memref<1x16x8xf32, #tpu.memory_space<vmem>>, vector<1x16x8xf32>
    %1 = vector.shape_cast %0 : vector<1x16x8xf32> to vector<16x8xf32>
    %cst = arith.constant 0.000000e+00 : f32
    %2 = vector.broadcast %cst : f32 to vector<1x8xf32>
    %3 = vector.extract_strided_slice %1 {offsets = [0, 0], sizes = [15, 8], strides = [1, 1]} : vector<16x8xf32> to vector<15x8xf32>
    %4 = tpu.concatenate %2, %3 in 0 : vector<1x8xf32>, vector<15x8xf32> -> vector<16x8xf32>
    %5 = arith.truncf %4 : vector<16x8xf32> to vector<16x8xbf16>
    %6 = arith.truncf %1 : vector<16x8xf32> to vector<16x8xbf16>
    %7 = vector.extract_strided_slice %1 {offsets = [1, 0], sizes = [15, 8], strides = [1, 1]} : vector<16x8xf32> to vector<15x8xf32>
    %8 = tpu.concatenate %7, %2 in 0 : vector<15x8xf32>, vector<1x8xf32> -> vector<16x8xf32>
    %9 = arith.truncf %8 : vector<16x8xf32> to vector<16x8xbf16>
    %c0_2 = arith.constant 0 : index
    %c0_3 = arith.constant 0 : index
    %c0_4 = arith.constant 0 : index
    %10 = vector.load %arg2[%c0_2, %c0_3, %c0_4] : memref<3x8x128xbf16, #tpu.memory_space<vmem>>, vector<1x8x128xbf16>
    %11 = vector.shape_cast %10 : vector<1x8x128xbf16> to vector<8x128xbf16>
    %cst_5 = arith.constant dense<0.000000e+00> : vector<16x128xf32>
    %12 = tpu.matmul %5, %11, %cst_5 {dimension_numbers = #tpu.dot_dimension_numbers<[1], [0], [0], [1], [0, 0, 1, 1], [], []>} : vector<16x8xbf16>, vector<8x128xbf16>, vector<16x128xf32> -> vector<16x128xf32>
    %c1 = arith.constant 1 : index
    %c0_6 = arith.constant 0 : index
    %c0_7 = arith.constant 0 : index
    %13 = vector.load %arg2[%c1, %c0_6, %c0_7] : memref<3x8x128xbf16, #tpu.memory_space<vmem>>, vector<1x8x128xbf16>
    %14 = vector.shape_cast %13 : vector<1x8x128xbf16> to vector<8x128xbf16>
    %cst_8 = arith.constant dense<0.000000e+00> : vector<16x128xf32>
    %15 = tpu.matmul %6, %14, %cst_8 {dimension_numbers = #tpu.dot_dimension_numbers<[1], [0], [0], [1], [0, 0, 1, 1], [], []>} : vector<16x8xbf16>, vector<8x128xbf16>, vector<16x128xf32> -> vector<16x128xf32>
    %16 = arith.addf %12, %15 : vector<16x128xf32>
    %c2 = arith.constant 2 : index
    %c0_9 = arith.constant 0 : index
    %c0_10 = arith.constant 0 : index
    %17 = vector.load %arg2[%c2, %c0_9, %c0_10] : memref<3x8x128xbf16, #tpu.memory_space<vmem>>, vector<1x8x128xbf16>
    %18 = vector.shape_cast %17 : vector<1x8x128xbf16> to vector<8x128xbf16>
    %cst_11 = arith.constant dense<0.000000e+00> : vector<16x128xf32>
    %19 = tpu.matmul %9, %18, %cst_11 {dimension_numbers = #tpu.dot_dimension_numbers<[1], [0], [0], [1], [0, 0, 1, 1], [], []>} : vector<16x8xbf16>, vector<8x128xbf16>, vector<16x128xf32> -> vector<16x128xf32>
    %20 = arith.addf %16, %19 : vector<16x128xf32>
    %c0_12 = arith.constant 0 : index
    %c0_13 = arith.constant 0 : index
    %21 = vector.load %arg3[%c0_12, %c0_13] : memref<1x128xf32, #tpu.memory_space<vmem>>, vector<1x128xf32>
    %22 = vector.broadcast %21 : vector<1x128xf32> to vector<16x128xf32>
    %23 = arith.addf %20, %22 : vector<16x128xf32>
    %cst_14 = arith.constant 0.000000e+00 : f32
    %24 = vector.broadcast %cst_14 : f32 to vector<16x128xf32>
    %25 = arith.maximumf %23, %24 : vector<16x128xf32>
    %cst_15 = arith.constant 0.000000e+00 : f32
    %26 = vector.broadcast %cst_15 : f32 to vector<1x128xf32>
    %27 = vector.extract_strided_slice %25 {offsets = [0, 0], sizes = [15, 128], strides = [1, 1]} : vector<16x128xf32> to vector<15x128xf32>
    %28 = tpu.concatenate %26, %27 in 0 : vector<1x128xf32>, vector<15x128xf32> -> vector<16x128xf32>
    %29 = arith.truncf %28 : vector<16x128xf32> to vector<16x128xbf16>
    %30 = arith.truncf %25 : vector<16x128xf32> to vector<16x128xbf16>
    %31 = vector.extract_strided_slice %25 {offsets = [1, 0], sizes = [15, 128], strides = [1, 1]} : vector<16x128xf32> to vector<15x128xf32>
    %32 = tpu.concatenate %31, %26 in 0 : vector<15x128xf32>, vector<1x128xf32> -> vector<16x128xf32>
    %33 = arith.truncf %32 : vector<16x128xf32> to vector<16x128xbf16>
    %c0_16 = arith.constant 0 : index
    %c0_17 = arith.constant 0 : index
    %c0_18 = arith.constant 0 : index
    %34 = vector.load %arg4[%c0_16, %c0_17, %c0_18] : memref<3x128x128xbf16, #tpu.memory_space<vmem>>, vector<1x128x128xbf16>
    %35 = vector.shape_cast %34 : vector<1x128x128xbf16> to vector<128x128xbf16>
    %cst_19 = arith.constant dense<0.000000e+00> : vector<16x128xf32>
    %36 = tpu.matmul %29, %35, %cst_19 {dimension_numbers = #tpu.dot_dimension_numbers<[1], [0], [0], [1], [0, 0, 1, 1], [], []>} : vector<16x128xbf16>, vector<128x128xbf16>, vector<16x128xf32> -> vector<16x128xf32>
    %c1_20 = arith.constant 1 : index
    %c0_21 = arith.constant 0 : index
    %c0_22 = arith.constant 0 : index
    %37 = vector.load %arg4[%c1_20, %c0_21, %c0_22] : memref<3x128x128xbf16, #tpu.memory_space<vmem>>, vector<1x128x128xbf16>
    %38 = vector.shape_cast %37 : vector<1x128x128xbf16> to vector<128x128xbf16>
    %cst_23 = arith.constant dense<0.000000e+00> : vector<16x128xf32>
    %39 = tpu.matmul %30, %38, %cst_23 {dimension_numbers = #tpu.dot_dimension_numbers<[1], [0], [0], [1], [0, 0, 1, 1], [], []>} : vector<16x128xbf16>, vector<128x128xbf16>, vector<16x128xf32> -> vector<16x128xf32>
    %40 = arith.addf %36, %39 : vector<16x128xf32>
    %c2_24 = arith.constant 2 : index
    %c0_25 = arith.constant 0 : index
    %c0_26 = arith.constant 0 : index
    %41 = vector.load %arg4[%c2_24, %c0_25, %c0_26] : memref<3x128x128xbf16, #tpu.memory_space<vmem>>, vector<1x128x128xbf16>
    %42 = vector.shape_cast %41 : vector<1x128x128xbf16> to vector<128x128xbf16>
    %cst_27 = arith.constant dense<0.000000e+00> : vector<16x128xf32>
    %43 = tpu.matmul %33, %42, %cst_27 {dimension_numbers = #tpu.dot_dimension_numbers<[1], [0], [0], [1], [0, 0, 1, 1], [], []>} : vector<16x128xbf16>, vector<128x128xbf16>, vector<16x128xf32> -> vector<16x128xf32>
    %44 = arith.addf %40, %43 : vector<16x128xf32>
    %c0_28 = arith.constant 0 : index
    %c0_29 = arith.constant 0 : index
    %45 = vector.load %arg5[%c0_28, %c0_29] : memref<1x128xf32, #tpu.memory_space<vmem>>, vector<1x128xf32>
    %46 = vector.broadcast %45 : vector<1x128xf32> to vector<16x128xf32>
    %47 = arith.addf %44, %46 : vector<16x128xf32>
    %cst_30 = arith.constant 0.000000e+00 : f32
    %48 = vector.broadcast %cst_30 : f32 to vector<16x128xf32>
    %49 = arith.maximumf %47, %48 : vector<16x128xf32>
    %cst_31 = arith.constant 0.000000e+00 : f32
    %50 = vector.broadcast %cst_31 : f32 to vector<1x128xf32>
    %51 = vector.extract_strided_slice %49 {offsets = [0, 0], sizes = [15, 128], strides = [1, 1]} : vector<16x128xf32> to vector<15x128xf32>
    %52 = tpu.concatenate %50, %51 in 0 : vector<1x128xf32>, vector<15x128xf32> -> vector<16x128xf32>
    %53 = arith.truncf %52 : vector<16x128xf32> to vector<16x128xbf16>
    %54 = arith.truncf %49 : vector<16x128xf32> to vector<16x128xbf16>
    %55 = vector.extract_strided_slice %49 {offsets = [1, 0], sizes = [15, 128], strides = [1, 1]} : vector<16x128xf32> to vector<15x128xf32>
    %56 = tpu.concatenate %55, %50 in 0 : vector<15x128xf32>, vector<1x128xf32> -> vector<16x128xf32>
    %57 = arith.truncf %56 : vector<16x128xf32> to vector<16x128xbf16>
    %c0_32 = arith.constant 0 : index
    %c0_33 = arith.constant 0 : index
    %c0_34 = arith.constant 0 : index
    %58 = vector.load %arg6[%c0_32, %c0_33, %c0_34] : memref<3x128x128xbf16, #tpu.memory_space<vmem>>, vector<1x128x128xbf16>
    %59 = vector.shape_cast %58 : vector<1x128x128xbf16> to vector<128x128xbf16>
    %cst_35 = arith.constant dense<0.000000e+00> : vector<16x128xf32>
    %60 = tpu.matmul %53, %59, %cst_35 {dimension_numbers = #tpu.dot_dimension_numbers<[1], [0], [0], [1], [0, 0, 1, 1], [], []>} : vector<16x128xbf16>, vector<128x128xbf16>, vector<16x128xf32> -> vector<16x128xf32>
    %c1_36 = arith.constant 1 : index
    %c0_37 = arith.constant 0 : index
    %c0_38 = arith.constant 0 : index
    %61 = vector.load %arg6[%c1_36, %c0_37, %c0_38] : memref<3x128x128xbf16, #tpu.memory_space<vmem>>, vector<1x128x128xbf16>
    %62 = vector.shape_cast %61 : vector<1x128x128xbf16> to vector<128x128xbf16>
    %cst_39 = arith.constant dense<0.000000e+00> : vector<16x128xf32>
    %63 = tpu.matmul %54, %62, %cst_39 {dimension_numbers = #tpu.dot_dimension_numbers<[1], [0], [0], [1], [0, 0, 1, 1], [], []>} : vector<16x128xbf16>, vector<128x128xbf16>, vector<16x128xf32> -> vector<16x128xf32>
    %64 = arith.addf %60, %63 : vector<16x128xf32>
    %c2_40 = arith.constant 2 : index
    %c0_41 = arith.constant 0 : index
    %c0_42 = arith.constant 0 : index
    %65 = vector.load %arg6[%c2_40, %c0_41, %c0_42] : memref<3x128x128xbf16, #tpu.memory_space<vmem>>, vector<1x128x128xbf16>
    %66 = vector.shape_cast %65 : vector<1x128x128xbf16> to vector<128x128xbf16>
    %cst_43 = arith.constant dense<0.000000e+00> : vector<16x128xf32>
    %67 = tpu.matmul %57, %66, %cst_43 {dimension_numbers = #tpu.dot_dimension_numbers<[1], [0], [0], [1], [0, 0, 1, 1], [], []>} : vector<16x128xbf16>, vector<128x128xbf16>, vector<16x128xf32> -> vector<16x128xf32>
    %68 = arith.addf %64, %67 : vector<16x128xf32>
    %c0_44 = arith.constant 0 : index
    %c0_45 = arith.constant 0 : index
    %69 = vector.load %arg7[%c0_44, %c0_45] : memref<1x128xf32, #tpu.memory_space<vmem>>, vector<1x128xf32>
    %70 = vector.broadcast %69 : vector<1x128xf32> to vector<16x128xf32>
    %71 = arith.addf %68, %70 : vector<16x128xf32>
    %72 = arith.addf %71, %25 : vector<16x128xf32>
    %cst_46 = arith.constant 0.000000e+00 : f32
    %73 = vector.broadcast %cst_46 : f32 to vector<16x128xf32>
    %74 = arith.maximumf %72, %73 : vector<16x128xf32>
    %cst_47 = arith.constant 0.000000e+00 : f32
    %75 = vector.broadcast %cst_47 : f32 to vector<1x128xf32>
    %c0_48 = arith.constant 0 : index
    %c0_49 = arith.constant 0 : index
    %76 = vector.load %arg15[%c0_48, %c0_49] : memref<18x128xf32, #tpu.memory_space<vmem>>, vector<1x128xf32>
    tpu.vector_store %arg15[%c0_48, %c0_49], %75 {strides = array<i32>} : memref<18x128xf32, #tpu.memory_space<vmem>>, vector<1x128xf32>,
    %cst_50 = arith.constant 0.000000e+00 : f32
    %77 = vector.broadcast %cst_50 : f32 to vector<1x128xf32>
    %c17 = arith.constant 17 : index
    %c0_51 = arith.constant 0 : index
    %78 = vector.load %arg15[%c17, %c0_51] : memref<18x128xf32, #tpu.memory_space<vmem>>, vector<1x128xf32>
    tpu.vector_store %arg15[%c17, %c0_51], %77 {strides = array<i32>} : memref<18x128xf32, #tpu.memory_space<vmem>>, vector<1x128xf32>,
    %c1_52 = arith.constant 1 : index
    %c0_53 = arith.constant 0 : index
    %79 = vector.load %arg15[%c1_52, %c0_53] : memref<18x128xf32, #tpu.memory_space<vmem>>, vector<16x128xf32>
    tpu.vector_store %arg15[%c1_52, %c0_53], %74 {strides = array<i32>} : memref<18x128xf32, #tpu.memory_space<vmem>>, vector<16x128xf32>,
    %c0_54 = arith.constant 0 : index
    %c0_55 = arith.constant 0 : index
    %80 = tpu.strided_load %arg15[%c0_54, %c0_55] {strides = array<i32: 2, 1>} : memref<18x128xf32, #tpu.memory_space<vmem>>, vector<8x128xf32>
    %81 = arith.truncf %80 : vector<8x128xf32> to vector<8x128xbf16>
    %c1_56 = arith.constant 1 : index
    %c0_57 = arith.constant 0 : index
    %82 = tpu.strided_load %arg15[%c1_56, %c0_57] {strides = array<i32: 2, 1>} : memref<18x128xf32, #tpu.memory_space<vmem>>, vector<8x128xf32>
    %83 = arith.truncf %82 : vector<8x128xf32> to vector<8x128xbf16>
    %c2_58 = arith.constant 2 : index
    %c0_59 = arith.constant 0 : index
    %84 = tpu.strided_load %arg15[%c2_58, %c0_59] {strides = array<i32: 2, 1>} : memref<18x128xf32, #tpu.memory_space<vmem>>, vector<8x128xf32>
    %85 = arith.truncf %84 : vector<8x128xf32> to vector<8x128xbf16>
    %c0_60 = arith.constant 0 : index
    %c0_61 = arith.constant 0 : index
    %c0_62 = arith.constant 0 : index
    %86 = vector.load %arg8[%c0_60, %c0_61, %c0_62] : memref<3x128x128xbf16, #tpu.memory_space<vmem>>, vector<1x128x128xbf16>
    %87 = vector.shape_cast %86 : vector<1x128x128xbf16> to vector<128x128xbf16>
    %cst_63 = arith.constant dense<0.000000e+00> : vector<8x128xf32>
    %88 = tpu.matmul %81, %87, %cst_63 {dimension_numbers = #tpu.dot_dimension_numbers<[1], [0], [0], [1], [0, 0, 1, 1], [], []>} : vector<8x128xbf16>, vector<128x128xbf16>, vector<8x128xf32> -> vector<8x128xf32>
    %c1_64 = arith.constant 1 : index
    %c0_65 = arith.constant 0 : index
    %c0_66 = arith.constant 0 : index
    %89 = vector.load %arg8[%c1_64, %c0_65, %c0_66] : memref<3x128x128xbf16, #tpu.memory_space<vmem>>, vector<1x128x128xbf16>
    %90 = vector.shape_cast %89 : vector<1x128x128xbf16> to vector<128x128xbf16>
    %cst_67 = arith.constant dense<0.000000e+00> : vector<8x128xf32>
    %91 = tpu.matmul %83, %90, %cst_67 {dimension_numbers = #tpu.dot_dimension_numbers<[1], [0], [0], [1], [0, 0, 1, 1], [], []>} : vector<8x128xbf16>, vector<128x128xbf16>, vector<8x128xf32> -> vector<8x128xf32>
    %92 = arith.addf %88, %91 : vector<8x128xf32>
    %c2_68 = arith.constant 2 : index
    %c0_69 = arith.constant 0 : index
    %c0_70 = arith.constant 0 : index
    %93 = vector.load %arg8[%c2_68, %c0_69, %c0_70] : memref<3x128x128xbf16, #tpu.memory_space<vmem>>, vector<1x128x128xbf16>
    %94 = vector.shape_cast %93 : vector<1x128x128xbf16> to vector<128x128xbf16>
    %cst_71 = arith.constant dense<0.000000e+00> : vector<8x128xf32>
    %95 = tpu.matmul %85, %94, %cst_71 {dimension_numbers = #tpu.dot_dimension_numbers<[1], [0], [0], [1], [0, 0, 1, 1], [], []>} : vector<8x128xbf16>, vector<128x128xbf16>, vector<8x128xf32> -> vector<8x128xf32>
    %96 = arith.addf %92, %95 : vector<8x128xf32>
    %c0_72 = arith.constant 0 : index
    %c0_73 = arith.constant 0 : index
    %97 = vector.load %arg9[%c0_72, %c0_73] : memref<1x128xf32, #tpu.memory_space<vmem>>, vector<1x128xf32>
    %98 = vector.broadcast %97 : vector<1x128xf32> to vector<8x128xf32>
    %99 = arith.addf %96, %98 : vector<8x128xf32>
    %cst_74 = arith.constant 0.000000e+00 : f32
    %100 = vector.broadcast %cst_74 : f32 to vector<8x128xf32>
    %101 = arith.maximumf %99, %100 : vector<8x128xf32>
    %cst_75 = arith.constant 0.000000e+00 : f32
    %102 = vector.broadcast %cst_75 : f32 to vector<1x128xf32>
    %103 = vector.extract_strided_slice %101 {offsets = [0, 0], sizes = [7, 128], strides = [1, 1]} : vector<8x128xf32> to vector<7x128xf32>
    %104 = tpu.concatenate %102, %103 in 0 : vector<1x128xf32>, vector<7x128xf32> -> vector<8x128xf32>
    %105 = arith.truncf %104 : vector<8x128xf32> to vector<8x128xbf16>
    %106 = arith.truncf %101 : vector<8x128xf32> to vector<8x128xbf16>
    %107 = vector.extract_strided_slice %101 {offsets = [1, 0], sizes = [7, 128], strides = [1, 1]} : vector<8x128xf32> to vector<7x128xf32>
    %108 = tpu.concatenate %107, %102 in 0 : vector<7x128xf32>, vector<1x128xf32> -> vector<8x128xf32>
    %109 = arith.truncf %108 : vector<8x128xf32> to vector<8x128xbf16>
    %c0_76 = arith.constant 0 : index
    %c0_77 = arith.constant 0 : index
    %c0_78 = arith.constant 0 : index
    %110 = vector.load %arg10[%c0_76, %c0_77, %c0_78] : memref<3x128x128xbf16, #tpu.memory_space<vmem>>, vector<1x128x128xbf16>
    %111 = vector.shape_cast %110 : vector<1x128x128xbf16> to vector<128x128xbf16>
    %cst_79 = arith.constant dense<0.000000e+00> : vector<8x128xf32>
    %112 = tpu.matmul %105, %111, %cst_79 {dimension_numbers = #tpu.dot_dimension_numbers<[1], [0], [0], [1], [0, 0, 1, 1], [], []>} : vector<8x128xbf16>, vector<128x128xbf16>, vector<8x128xf32> -> vector<8x128xf32>
    %c1_80 = arith.constant 1 : index
    %c0_81 = arith.constant 0 : index
    %c0_82 = arith.constant 0 : index
    %113 = vector.load %arg10[%c1_80, %c0_81, %c0_82] : memref<3x128x128xbf16, #tpu.memory_space<vmem>>, vector<1x128x128xbf16>
    %114 = vector.shape_cast %113 : vector<1x128x128xbf16> to vector<128x128xbf16>
    %cst_83 = arith.constant dense<0.000000e+00> : vector<8x128xf32>
    %115 = tpu.matmul %106, %114, %cst_83 {dimension_numbers = #tpu.dot_dimension_numbers<[1], [0], [0], [1], [0, 0, 1, 1], [], []>} : vector<8x128xbf16>, vector<128x128xbf16>, vector<8x128xf32> -> vector<8x128xf32>
    %116 = arith.addf %112, %115 : vector<8x128xf32>
    %c2_84 = arith.constant 2 : index
    %c0_85 = arith.constant 0 : index
    %c0_86 = arith.constant 0 : index
    %117 = vector.load %arg10[%c2_84, %c0_85, %c0_86] : memref<3x128x128xbf16, #tpu.memory_space<vmem>>, vector<1x128x128xbf16>
    %118 = vector.shape_cast %117 : vector<1x128x128xbf16> to vector<128x128xbf16>
    %cst_87 = arith.constant dense<0.000000e+00> : vector<8x128xf32>
    %119 = tpu.matmul %109, %118, %cst_87 {dimension_numbers = #tpu.dot_dimension_numbers<[1], [0], [0], [1], [0, 0, 1, 1], [], []>} : vector<8x128xbf16>, vector<128x128xbf16>, vector<8x128xf32> -> vector<8x128xf32>
    %120 = arith.addf %116, %119 : vector<8x128xf32>
    %c0_88 = arith.constant 0 : index
    %c0_89 = arith.constant 0 : index
    %121 = vector.load %arg11[%c0_88, %c0_89] : memref<1x128xf32, #tpu.memory_space<vmem>>, vector<1x128xf32>
    %122 = vector.broadcast %121 : vector<1x128xf32> to vector<8x128xf32>
    %123 = arith.addf %120, %122 : vector<8x128xf32>
    %c0_90 = arith.constant 0 : index
    %c0_91 = arith.constant 0 : index
    %124 = vector.load %arg12[%c0_90, %c0_91] : memref<128x128xbf16, #tpu.memory_space<vmem>>, vector<128x128xbf16>
    %cst_92 = arith.constant dense<0.000000e+00> : vector<8x128xf32>
    %125 = tpu.matmul %83, %124, %cst_92 {dimension_numbers = #tpu.dot_dimension_numbers<[1], [0], [0], [1], [0, 0, 1, 1], [], []>} : vector<8x128xbf16>, vector<128x128xbf16>, vector<8x128xf32> -> vector<8x128xf32>
    %c0_93 = arith.constant 0 : index
    %c0_94 = arith.constant 0 : index
    %126 = vector.load %arg13[%c0_93, %c0_94] : memref<1x128xf32, #tpu.memory_space<vmem>>, vector<1x128xf32>
    %127 = vector.broadcast %126 : vector<1x128xf32> to vector<8x128xf32>
    %128 = arith.addf %125, %127 : vector<8x128xf32>
    %129 = arith.addf %123, %128 : vector<8x128xf32>
    %cst_95 = arith.constant 0.000000e+00 : f32
    %130 = vector.broadcast %cst_95 : f32 to vector<8x128xf32>
    %131 = arith.maximumf %129, %130 : vector<8x128xf32>
    %cst_96 = arith.constant dense<0.000000e+00> : vector<128xf32>
    %132 = vector.multi_reduction <add>, %131, %cst_96 [0] : vector<8x128xf32> to vector<128xf32>
    %133 = vector.shape_cast %132 : vector<128xf32> to vector<1x128xf32>
    %cst_97 = arith.constant 8.000000e+00 : f32
    %134 = vector.broadcast %cst_97 : f32 to vector<1x128xf32>
    %135 = arith.divf %133, %134 : vector<1x128xf32>
    %c0_98 = arith.constant 0 : index
    %c0_99 = arith.constant 0 : index
    %c0_100 = arith.constant 0 : index
    %136 = vector.load %arg14[%c0_98, %c0_99, %c0_100] : memref<1x1x128xf32, #tpu.memory_space<vmem>>, vector<1x1x128xf32>
    %137 = vector.shape_cast %136 : vector<1x1x128xf32> to vector<1x128xf32>
    %138 = vector.shape_cast %135 : vector<1x128xf32> to vector<1x1x128xf32>
    tpu.vector_store %arg14[%c0_98, %c0_99, %c0_100], %138 {strides = array<i32>} : memref<1x1x128xf32, #tpu.memory_space<vmem>>, vector<1x1x128xf32>,
    return
  }
  func.func @transform_0(%arg0: i32) -> (i32, i32, i32) {
    %c0_i32 = arith.constant 0 : i32
    %c0_i32_0 = arith.constant 0 : i32
    %c0_i32_1 = arith.constant 0 : i32
    return %arg0, %c0_i32, %c0_i32_0 : i32, i32, i32
  }
  func.func @transform_1(%arg0: i32) -> (i32, i32, i32) {
    %c0_i32 = arith.constant 0 : i32
    %c0_i32_0 = arith.constant 0 : i32
    %c0_i32_1 = arith.constant 0 : i32
    %c0_i32_2 = arith.constant 0 : i32
    return %c0_i32, %c0_i32_0, %c0_i32_1 : i32, i32, i32
  }
  func.func @transform_2(%arg0: i32) -> (i32, i32) {
    %c0_i32 = arith.constant 0 : i32
    %c0_i32_0 = arith.constant 0 : i32
    %c0_i32_1 = arith.constant 0 : i32
    return %c0_i32, %c0_i32_0 : i32, i32
  }
  func.func @transform_3(%arg0: i32) -> (i32, i32, i32) {
    %c0_i32 = arith.constant 0 : i32
    %c0_i32_0 = arith.constant 0 : i32
    %c0_i32_1 = arith.constant 0 : i32
    %c0_i32_2 = arith.constant 0 : i32
    return %c0_i32, %c0_i32_0, %c0_i32_1 : i32, i32, i32
  }
  func.func @transform_4(%arg0: i32) -> (i32, i32) {
    %c0_i32 = arith.constant 0 : i32
    %c0_i32_0 = arith.constant 0 : i32
    %c0_i32_1 = arith.constant 0 : i32
    return %c0_i32, %c0_i32_0 : i32, i32
  }
  func.func @transform_5(%arg0: i32) -> (i32, i32, i32) {
    %c0_i32 = arith.constant 0 : i32
    %c0_i32_0 = arith.constant 0 : i32
    %c0_i32_1 = arith.constant 0 : i32
    %c0_i32_2 = arith.constant 0 : i32
    return %c0_i32, %c0_i32_0, %c0_i32_1 : i32, i32, i32
  }
  func.func @transform_6(%arg0: i32) -> (i32, i32) {
    %c0_i32 = arith.constant 0 : i32
    %c0_i32_0 = arith.constant 0 : i32
    %c0_i32_1 = arith.constant 0 : i32
    return %c0_i32, %c0_i32_0 : i32, i32
  }
  func.func @transform_7(%arg0: i32) -> (i32, i32, i32) {
    %c0_i32 = arith.constant 0 : i32
    %c0_i32_0 = arith.constant 0 : i32
    %c0_i32_1 = arith.constant 0 : i32
    %c0_i32_2 = arith.constant 0 : i32
    return %c0_i32, %c0_i32_0, %c0_i32_1 : i32, i32, i32
  }
  func.func @transform_8(%arg0: i32) -> (i32, i32) {
    %c0_i32 = arith.constant 0 : i32
    %c0_i32_0 = arith.constant 0 : i32
    %c0_i32_1 = arith.constant 0 : i32
    return %c0_i32, %c0_i32_0 : i32, i32
  }
  func.func @transform_9(%arg0: i32) -> (i32, i32, i32) {
    %c0_i32 = arith.constant 0 : i32
    %c0_i32_0 = arith.constant 0 : i32
    %c0_i32_1 = arith.constant 0 : i32
    %c0_i32_2 = arith.constant 0 : i32
    return %c0_i32, %c0_i32_0, %c0_i32_1 : i32, i32, i32
  }
  func.func @transform_10(%arg0: i32) -> (i32, i32) {
    %c0_i32 = arith.constant 0 : i32
    %c0_i32_0 = arith.constant 0 : i32
    %c0_i32_1 = arith.constant 0 : i32
    return %c0_i32, %c0_i32_0 : i32, i32
  }
  func.func @transform_11(%arg0: i32) -> (i32, i32) {
    %c0_i32 = arith.constant 0 : i32
    %c0_i32_0 = arith.constant 0 : i32
    %c0_i32_1 = arith.constant 0 : i32
    return %c0_i32, %c0_i32_0 : i32, i32
  }
  func.func @transform_12(%arg0: i32) -> (i32, i32) {
    %c0_i32 = arith.constant 0 : i32
    %c0_i32_0 = arith.constant 0 : i32
    %c0_i32_1 = arith.constant 0 : i32
    return %c0_i32, %c0_i32_0 : i32, i32
  }
  func.func @transform_13(%arg0: i32) -> (i32, i32, i32) {
    %c0_i32 = arith.constant 0 : i32
    %c0_i32_0 = arith.constant 0 : i32
    %c0_i32_1 = arith.constant 0 : i32
    return %arg0, %c0_i32, %c0_i32_0 : i32, i32, i32
  }
}

</mosaic_0001>

<bundles_post_ra>
// kernel: _lambda_.1
= control target key start
LH: loop header
LB: loop body
LE: loop exit
PB: predicated region body
PF: predicated region fallthrough
CT: control target
= control target key end

     0   :  { %s3752_s0 = inlined_call_operand.vmem [shape: f32[2,16,8], index: 0, kind: input, shape index: {}]   ;;  %s3753_s1 = inlined_call_operand.hbm [shape: bf16[3,8,128], index: 1, kind: input, shape index: {}]   ;;  %s3754_s2 = inlined_call_operand.vmem [shape: f32[1,128], index: 2, kind: input, shape index: {}, may-alias: {2,4,6,8,10,12}]   ;;  %s3755_s3 = inlined_call_operand.hbm [shape: bf16[3,128,128], index: 3, kind: input, shape index: {}]   ;;  %s3756_s4 = inlined_call_operand.vmem [shape: f32[1,128], index: 4, kind: input, shape index: {}, may-alias: {2,4,6,8,10,12}]   ;;  %s3757_s5 = inlined_call_operand.hbm [shape: bf16[3,128,128], index: 5, kind: input, shape index: {}]   ;;  %s3758_s6 = inlined_call_operand.vmem [shape: f32[1,128], index: 6, kind: input, shape index: {}, may-alias: {2,4,6,8,10,12}]   ;;  %s3759_s7 = inlined_call_operand.hbm [shape: bf16[3,128,128], index: 7, kind: input, shape index: {}]   ;;  %s3760_s8 = inlined_call_operand.vmem [shape: f32[1,128], index: 8, kind: input, shape index: {}, may-alias: {2,4,6,8,10,12}]   ;;  %s3761_s9 = inlined_call_operand.hbm [shape: bf16[3,128,128], index: 9, kind: input, shape index: {}]   ;;  %s3762_s10 = inlined_call_operand.vmem [shape: f32[1,128], index: 10, kind: input, shape index: {}, may-alias: {2,4,6,8,10,12}]   ;;  %s3763_s11 = inlined_call_operand.vmem [shape: bf16[128,128], index: 11, kind: input, shape index: {}]   ;;  %s3764_s12 = inlined_call_operand.vmem [shape: f32[1,128], index: 12, kind: input, shape index: {}, may-alias: {2,4,6,8,10,12}]   ;;  %s3765_s13 = inlined_call_operand.hbm [shape: f32[2,1,128], index: 13, kind: output, shape index: {}]  }
   0x1   :  { %3772 = sst [smem:[#allocation22_spill]] %s3755_s3 }
   0x2   :  { %18 = vsyncpa [#allocation4], 0 }
   0x3   :  { %19 = vsyncpa [#allocation7], 0 }
   0x4   :  { %20 = vsyncpa [#allocation10], 0 }
   0x5   :  { %21 = vsyncpa [#allocation5], 0 }
   0x6   :  { %23 = vsyncpa [#allocation5 + $0x1], 0  ;;  %s3339_s25 = smov 0   ;;  %s3341_s26 = smov 0  }
   0x7   :  { %s3343_s27 = smov 0   ;;  %s3345_s28 = smov 0  }
   0x8 LB: > { %3773 = sst [smem:[#allocation17_spill]] %s3244_s25  ;;  %s3360_s29 = sadd.s32 4294967295, %s3256_s28   ;;  %s3256_s28 = sphi %s3345_s28, %s3798_s28   ;;  %s3252_s27 = sphi %s3343_s27, %s3800_s27   ;;  %s3248_s26 = sphi %s3341_s26, %s3802_s26   ;;  %s3244_s25 = sphi %s3339_s25, %s3801_s25  }
   0x9   : > { %3774 = sst [smem:[#allocation18_spill]] %s3252_s27  ;;  %s2299_s30 = sadd.s32 4294967294, %s3256_s28  }
   0xa   : > { %s3364_s14 = sadd.s32 1, %s3256_s28   ;;  %s314_s15 = sadd.s32 1, %s3252_s27 }
   0xb   : > { %3775 = sst [smem:[#allocation19_spill]] %s3364_s14  ;;  %s311_s16 = ssub.s32 %s3256_s28, %s3364_s14 }
   0xc   : > { %p324_p0 = scmp.ne.s32.totalorder %s3252_s27, %s3248_s26  ;;  %p312_p1 = scmp.eq.s32.totalorder %s311_s16, 0 }
   0xd   : > { %p325_p2 = scmp.eq.s32.totalorder %s3360_s29, 1  ;;  %p330_p3 = scmp.ne.s32.totalorder %s3248_s26, %s3244_s25 }
   0xe   : > { %p331_p4 = scmp.eq.s32.totalorder %s2299_s30, 1  ;;  %p2300_p7 = scmp.ge.s32.totalorder %s3256_s28, 1 }
   0xf   : > { %s3375_s17 = scalar_select %p312_p1, %s3252_s27, %s314_s15  }
  0x10   : > { %p3377_p5 = por %p325_p2, %p324_p0  ;;  %p3381_p6 = por %p331_p4, %p330_p3 }
  0x11   : > { %3776 = sst [smem:[#allocation20_spill]] %s3375_s17  ;;  %p338_p8 = scmp.lt.s32.totalorder %s3256_s28, 3 }
  0x12   : > { %s3778_s19 = scalar_select %p3381_p6, 1, 0 }
  0x13   : > { %p3771_p9 = scmp.eq.s32.totalorder %s3360_s29, 0  ;;  %p3388_p10 = pnand %p2300_p7, %p338_p8 }
  0x14   : > { %3779 = sst [smem:[#allocation21_spill]] %s3778_s19  ;;  %s3258_s21 = smov [#allocation6]  }
  0x15   : > { %p2877_p11 = pneg %p3388_p10  ;;  %s366_s22 = sshll.u32 %s3258_s21, 4  ;;  %s367_s22 = int_to_ptr.vmem [resolvable:$true] %s366_s22 }
  0x16   : > { %s3259_s24 = smov [#allocation9]   ;;  %s3260_s15 = smov [#allocation3]  }
  0x17   : > { %p3396_p12 = pnand %p3771_p9, %p2877_p11  ;;  %s398_s30 = sshll.u32 %s3259_s24, 4  ;;  %s399_s30 = int_to_ptr.vmem [resolvable:$true] %s398_s30 }
  0x18   : > { %s350_s16 = sshll.u32 %s3260_s15, 4  ;;  %s3065_s27 = scalar_lea.vmem %s367_s22, 3072  ;;  %s351_s16 = int_to_ptr.vmem [resolvable:$true] %s350_s16 }
  0x19   : > { %p3402_p13 = pneg %p3396_p12  ;;  %p3066_p0 = scmp.ne.s32.totalorder %s367_s22, %s3065_s27 }
  0x1a   : > { %p3073_p3 = scmp.lt.s32.totalorder %s367_s22, %s367_s22  ;;  %p3074_p4 = scmp.lt.s32.totalorder %s3065_s27, %s3065_s27 }
  0x1b   : > { %p3068_p1 = pnand %p3066_p0, %p3402_p13 }
  0x1c   : > { %p3075_p7 = por %p3074_p4, %p3073_p3 }
  0x1d   : > { %p3069_p2 = pneg %p3068_p1 }
  0x1f   : > { %p3076_p8 = pnand %p3075_p7, %p3069_p2 }
  0x21   : > { %3079 = shalt.err (!%p3076_p8)
}
  0x22   : > { %s3261_s21 = smov 64   ;;  %s3262_s24 = smov 4  }
  0x23   : > { %s3783_s3 = sld [smem:[#allocation22_spill]]  ;;  %s3091_s19 = scalar_lea.vmem %s399_s30, 3072 }
  0x24   : > { %p3092_p11 = scmp.ne.s32.totalorder %s399_s30, %s3091_s19  ;;  %p3099_p3 = scmp.lt.s32.totalorder %s399_s30, %s399_s30 }
  0x25   : > { %p3100_p2 = scmp.lt.s32.totalorder %s3091_s19, %s3091_s19 }
  0x26   : > { %p3094_p0 = pnand %p3092_p11, %p3402_p13 }
  0x27   : > { %p3101_p4 = por %p3100_p2, %p3099_p3 }
  0x28   : > { %p3095_p1 = pneg %p3094_p0 }
  0x29   : > { %2883 = dma.hbm_to_vmem [thread:$0]  (!%p3396_p12), %s3783_s3, 3072, %s367_s22, [#allocation7], %s3261_s21, %s3261_s21, %s3262_s24  }
  0x2a   : > { %p3102_p7 = pnand %p3101_p4, %p3095_p1 }
  0x2c   : > { %3105 = shalt.err (!%p3102_p7)
}
  0x2d   : > { %2889 = dma.hbm_to_vmem [thread:$0]  (!%p3396_p12), %s3759_s7, 3072, %s399_s30, [#allocation10], %s3261_s21, %s3261_s21, %s3262_s24  }
  0x2e   : > { %s3117_s14 = scalar_lea.vmem %s351_s16, 192  ;;  %p3125_p9 = scmp.lt.s32.totalorder %s351_s16, %s351_s16 }
  0x2f   : > { %p3118_p8 = scmp.ne.s32.totalorder %s351_s16, %s3117_s14  ;;  %p3126_p3 = scmp.lt.s32.totalorder %s3117_s14, %s3117_s14 }
  0x31   : > { %p3120_p11 = pnand %p3118_p8, %p3402_p13  ;;  %p3127_p1 = por %p3126_p3, %p3125_p9 }
  0x33   : > { %p3121_p0 = pneg %p3120_p11 }
  0x35   : > { %p3128_p2 = pnand %p3127_p1, %p3121_p0 }
  0x37   : > { %3131 = shalt.err (!%p3128_p2)
}
  0x38   : > { %2880 = dma.hbm_to_vmem [thread:$0]  (!%p3396_p12), %s3753_s1, 192, %s351_s16, [#allocation4], %s3261_s21, %s3261_s21, %s3262_s24  }
  0x39   : > { %s3263_s22 = smov [#allocation8]   ;;  %s3264_s15 = smov [#allocation11]  }
  0x3a   : > { %s382_s30 = sshll.u32 %s3263_s22, 4  ;;  %s414_s27 = sshll.u32 %s3264_s15, 4  ;;  %s383_s30 = int_to_ptr.vmem [resolvable:$true] %s382_s30  ;;  %s415_s27 = int_to_ptr.vmem [resolvable:$true] %s414_s27 }
  0x3b   : > { %s3143_s3 = scalar_lea.vmem %s383_s30, 3072  ;;  %p3151_p8 = scmp.lt.s32.totalorder %s383_s30, %s383_s30 }
  0x3c   : > { %p3144_p4 = scmp.ne.s32.totalorder %s383_s30, %s3143_s3  ;;  %p3152_p11 = scmp.lt.s32.totalorder %s3143_s3, %s3143_s3 }
  0x3e   : > { %p3146_p9 = pnand %p3144_p4, %p3402_p13  ;;  %p3153_p0 = por %p3152_p11, %p3151_p8 }
  0x40   : > { %p3147_p7 = pneg %p3146_p9 }
  0x42   : > { %p3154_p3 = pnand %p3153_p0, %p3147_p7 }
  0x44   : > { %3157 = shalt.err (!%p3154_p3)
}
  0x45   : > { %2886 = dma.hbm_to_vmem [thread:$0]  (!%p3396_p12), %s3757_s5, 3072, %s383_s30, [#allocation7], %s3261_s21, %s3261_s21, %s3262_s24  }
  0x46   : > { %s3169_s19 = scalar_lea.vmem %s415_s27, 3072  ;;  %p3177_p9 = scmp.lt.s32.totalorder %s415_s27, %s415_s27 }
  0x47   : > { %p3170_p1 = scmp.ne.s32.totalorder %s415_s27, %s3169_s19  ;;  %p3178_p8 = scmp.lt.s32.totalorder %s3169_s19, %s3169_s19 }
  0x49   : > { %p3172_p2 = pnand %p3170_p1, %p3402_p13  ;;  %p3179_p7 = por %p3178_p8, %p3177_p9 }
  0x4b   : > { %p3173_p4 = pneg %p3172_p2 }
  0x4d   : > { %p3180_p11 = pnand %p3179_p7, %p3173_p4 }
  0x4f   : > { %3183 = shalt.err (!%p3180_p11)
}
  0x50   : > { %2892 = dma.hbm_to_vmem [thread:$0]  (!%p3396_p12), %s3761_s9, 3072, %s415_s27, [#allocation10], %s3261_s21, %s3261_s21, %s3262_s24  }
  0x51   : > { %447 = sbr.rel (%p3388_p10) target bundleno = 1301 (0x515), region = 72  ;;  %p3784_p13 = scmp.eq.s32.totalorder (!%p3388_p10), %s3360_s29, 0 }
  0x56   : > { %3227 = dma.done.wait (%p3784_p13), [#allocation4], 192   ;;  %p3785_p0 = pmov %p3784_p13 }
  0x58   : > { %3229 = vsyncadd (%p3785_p0), [#allocation4], 4294967104  ;;  %p3786_p3 = pmov %p3785_p0 }
  0x59   : > { %p3787_p1 = pmov %p3785_p0 }
  0x5a   : > { %3231 = dma.done.wait (%p3786_p3), [#allocation7], 6144  }
  0x5b   : > { %3233 = vsyncadd (%p3787_p1), [#allocation7], 4294961152  ;;  %p3788_p2 = pmov %p3785_p0 }
  0x5c   : > { %p3789_p12 = pmov %p3785_p0 }
  0x5d   : > { %3235 = dma.done.wait (%p3788_p2), [#allocation10], 6144  }
  0x5e   : > { %3237 = vsyncadd (%p3789_p12), [#allocation10], 4294961152  ;;  %p506_p10 = scmp.lt.s32.totalorder %s3360_s29, 1  ;;  %v3265_v0 = vmov 0.0   ;;  %vm3266_vm0 = vmmov 0   ;;  %vm540_vm1 = vcmask 1043456  }
  0x5f   : > { %1390 = vst [vmem:[#allocation2] sm:$0x1] %v3265_v0  ;;  %2577 = vmatprep.subr.bf16.mxu0 %v3265_v0  ;;  %2579 = vmatprep.mubr.msk.bf16.mxu0 %vm3266_vm0, %v3265_v0  ;;  %v535_v1 = vld [vmem:[#allocation3 + $0x4] sm:$0xf]  ;;  %vm516_vm2 = vcmask 1040384   ;;  %vm525_vm3 = vcmask 1046528  }
  0x60   : > { %s507_s17 = scalar_select %p506_p10, %s3360_s29, 1  ;;  %2595 = vmatprep.subr.bf16.mxu1 %v3265_v0  ;;  %2611 = vmatprep.mubr.msk.bf16.mxu1 %vm3266_vm0, %v3265_v0  ;;  %v542_v4 = vsel %vm540_vm1, %v535_v1, 0  ;;  %v533_v7 = vld [vmem:[#allocation3] sm:$0xf]  ;;  %v2950_v8 = vld [vmem:[#allocation6 + $0x78] sm:$0xff]   ;;  %vm536_vm4 = vcmask 64512   ;;  %vm3525_vm5 = vmneg %vm516_vm2 }
  0x61   : > { %2578 = vmatpush3.bf16.msra.mxu0 %v542_v4  ;;  %v633_v12 = vld [vmem:[#allocation3 + $0x8] sm:$0xf]  ;;  %v589_v13 = vsel %vm540_vm1, %v533_v7, 0  ;;  %2596 = vmatpush3.bf16.msra.mxu1 %v2950_v8  ;;  %v2951_v21 = vld [vmem:[#allocation6 + $0x70] sm:$0xff]   ;;  %v2953_v23 = vld [vmem:[#allocation6 + $0x68] sm:$0xff]   ;;  %vm3267_vm6 = vmmov 1  }
  0x62   : > { %s2453_s20 = sshll.u32 %s507_s17, 4  ;;  %2583 = vmatprep.subr.bf16.mxu0 %v3265_v0  ;;  %v638_v15 = vsel %vm540_vm1, %v633_v12, 0  ;;  %2597 = vmatprep.subr.bf16.mxu1 %v3265_v0  ;;  %v2952_v22 = vld [vmem:[#allocation6 + $0x38] sm:$0xff]   ;;  %v2954_v24 = vld [vmem:[#allocation6 + $0x30] sm:$0xff]   ;;  %v2955_v25 = vld [vmem:[#allocation6 + $0x60] sm:$0xff]   ;;  %s504_s22 = sand.u32 1, %s3248_s26  }
  0x63   : > { %s510_s24 = scalar_lea.vmem %s3752_s0, %s2453_s20  ;;  %v2956_v26 = vld [vmem:[#allocation6 + $0x28] sm:$0xff]   ;;  %v2957_v27 = vld [vmem:[#allocation6 + $0x58] sm:$0xff]   ;;  %v2958_v28 = vld [vmem:[#allocation6 + $0x20] sm:$0xff]   ;;  %s2450_s30 = sshll.u32 %s3360_s29, 4 }
  0x64   : > { %v512_v2 = vld [vmem:[%s510_s24] sm:$0xff]  ;;  %v513_v3 = vld [vmem:[%s510_s24 + $0x8] sm:$0xff]  ;;  %v2959_v29 = vld [vmem:[#allocation6 + $0x50] sm:$0xff]   ;;  %s505_s15 = scalar_lea.vmem [#allocation12], %s504_s22  ;;  %s2192_s19 = scalar_lea.hbm %s3765_s13, %s2450_s30 }
  0x65   : > { %v517_v5 = vrot.slane %v512_v2, 7  ;;  %v524_v6 = vpack.c.bf16 %v513_v3, %v512_v2  ;;  %v518_v9 = vrot.slane %v513_v3, 7  ;;  %v526_v10 = vrot.slane %v512_v2, 1  ;;  %2598 = vmatpush3.bf16.msra.mxu1 %v2951_v21  ;;  %v2960_v30 = vld [vmem:[#allocation6 + $0x18] sm:$0xff]   ;;  %v2961_v31 = vld [vmem:[#allocation6 + $0x48] sm:$0xff]   ;;  %v2962_v32 = vld [vmem:[#allocation6 + $0x10] sm:$0xff]  }
  0x66   : > { %v527_v11 = vrot.slane %v513_v3, 1  ;;  %2599 = vmatprep.subr.bf16.mxu1 %v3265_v0  ;;  %v2963_v33 = vld [vmem:[#allocation6 + $0x40] sm:$0xff]   ;;  %v2964_v34 = vld [vmem:[#allocation6 + $0x8] sm:$0xff]   ;;  %v2318_v46 = vld [vmem:[%s3754_s2] ss:$0 sm:$0xff]  ;;  %s2194_s27 = sshll.u32 %s505_s15, 4  ;;  %s2195_s27 = int_to_ptr.vmem [resolvable:$true] %s2194_s27 }
  0x67   : > { %v522_v14 = vsel %vm516_vm2, 0.0, %v517_v5  ;;  %2580 = vmatmul.mubr.msk.bf16.vlgmr.msra.gmra.mxu0 %vm536_vm4, %v524_v6  ;;  %v519_v17 = vsel %vm516_vm2, %v517_v5, %v518_v9  ;;  %v2965_v35 = vld [vmem:[#allocation6] sm:$0xff]   ;;  %v2966_v57 = vld [vmem:[#allocation6 + $0xb8] sm:$0xff]   ;;  %vm3537_vm7 = vmpackc.low %vm3267_vm6, %vm3525_vm5  ;;  %s2182_s3 = scalar_lea.sflag [#allocation5], %s504_s22  ;;  %s3184_s25 = scalar_lea.vmem %s2195_s27, 16 }
  0x68   : > { %v531_v16 = vsel %vm525_vm3, %v527_v11, 0.0  ;;  %2584 = vmatpush3.bf16.msra.mxu0 %v589_v13  ;;  %2585 = vmatprep.mubr.msk.bf16.mxu0 %vm3266_vm0, %v3265_v0  ;;  %v523_v18 = vpack.c.bf16 %v519_v17, %v522_v14  ;;  %v528_v19 = vsel %vm525_vm3, %v526_v10, %v527_v11  ;;  %v2967_v2 = vld [vmem:[#allocation6 + $0xb0] sm:$0xff]   ;;  %v2968_v3 = vld [vmem:[#allocation6 + $0xa8] sm:$0xff]   ;;  %v2969_v4 = vld [vmem:[#allocation6 + $0xa0] sm:$0xff]   ;;  %p3185_p4 = scmp.ne.s32.totalorder %s2195_s27, %s3184_s25  ;;  %s3268_s17 = smov [#allocation12]  }
  0x69   : > { %2589 = vmatprep.subr.bf16.mxu0 %v3265_v0  ;;  %v532_v20 = vpack.c.bf16 %v531_v16, %v528_v19  ;;  %2600 = vmatpush3.bf16.msra.mxu1 %v2953_v23  ;;  %v2970_v5 = vld [vmem:[#allocation6 + $0x98] sm:$0xff]   ;;  %v2971_v6 = vld [vmem:[#allocation6 + $0x90] sm:$0xff]   ;;  %v2972_v7 = vld [vmem:[#allocation6 + $0x88] sm:$0xff]   ;;  %s3188_s20 = sshll.u32 %s3268_s17, 4  ;;  %s3189_s20 = int_to_ptr.vmem [resolvable:$false] %s3188_s20 }
  0x6a   : > { %2601 = vmatprep.subr.bf16.mxu1 %v3265_v0  ;;  %v2973_v10 = vld [vmem:[#allocation6 + $0x80] sm:$0xff]   ;;  %vm3559_vm8 = vmpackc.low %vm525_vm3, %vm3267_vm6  ;;  %v2974_v14 = vld [vmem:[#allocation8 + $0x78] sm:$0xff]   ;;  %p3186_p9 = pnand %p3185_p4, %p3377_p5  ;;  %s3190_s29 = scalar_lea.vmem %s3189_s20, 32 }
  0x6b   : > { %v2975_v16 = vld [vmem:[#allocation8 + $0x70] sm:$0xff]   ;;  %v2980_v19 = vld [vmem:[#allocation8 + $0x28] sm:$0xff]   ;;  %v2982_v21 = vld [vmem:[#allocation8 + $0x20] sm:$0xff]   ;;  %p3191_p7 = scmp.lt.s32.totalorder %s2195_s27, %s3189_s20  ;;  %p3192_p11 = scmp.lt.s32.totalorder %s3190_s29, %s3184_s25 }
  0x6c   : > { %v2978_v17 = vld [vmem:[#allocation8 + $0x30] sm:$0xff]   ;;  %v2996_v63 = vld [vmem:[#allocation8 + $0x88] sm:$0xff]   ;;  %vm2426_vm9 = vmpackc.low %vm3525_vm5, %vm3525_vm5  ;;  %p3187_p8 = pneg %p3186_p9 }
  0x6d   : > { %2602 = vmatpush3.bf16.msra.mxu1 %v2955_v25  ;;  %v2983_v23 = vld [vmem:[#allocation8 + $0x50] sm:$0xff]   ;;  %v2985_v25 = vld [vmem:[#allocation8 + $0x48] sm:$0xff]   ;;  %vm2437_vm10 = vmpackc.low %vm525_vm3, %vm525_vm3  ;;  %p3193_p13 = por %p3192_p11, %p3191_p7 }
  0x6e   : > { %2603 = vmatprep.subr.bf16.mxu1 %v3265_v0  ;;  %v3003_v12 = vld [vmem:[#allocation9 + $0x28] sm:$0xff]  }
  0x6f   : > { %2586 = vmatmul.mubr.msk.bf16.vlgmr.msra.gmra.mxu0 %vm536_vm4, %v523_v18  ;;  %v2977_v18 = vld [vmem:[#allocation8 + $0x68] sm:$0xff]   ;;  %p3194_p0 = pnand %p3193_p13, %p3187_p8 }
  0x70   : > { %2590 = vmatpush3.bf16.msra.mxu0 %v638_v15  ;;  %2591 = vmatprep.mubr.msk.bf16.mxu0 %vm3266_vm0, %v3265_v0  ;;  %v2976_v15 = vld [vmem:[#allocation8 + $0x38] sm:$0xff]   ;;  %v3041_v58 = vld [vmem:[%s3763_s11 + $0x30] sm:$0xff]  }
  0x71   : > { %2615 = vmatprep.subr.bf16.mxu0 %v3265_v0  ;;  %2604 = vmatpush3.bf16.msra.mxu1 %v2957_v27  ;;  %v2987_v27 = vld [vmem:[#allocation8 + $0x40] sm:$0xff]  }
  0x72   : > { %2605 = vmatprep.subr.bf16.mxu1 %v3265_v0 }
  0x75   : > { %2606 = vmatpush3.bf16.msra.mxu1 %v2959_v29  ;;  %v2989_v29 = vld [vmem:[#allocation8] sm:$0xff]  }
  0x76   : > { %2607 = vmatprep.subr.bf16.mxu1 %v3265_v0 }
  0x77   : > { %2592 = vmatmul.mubr.msk.bf16.vlgmr.msra.gmra.mxu0 %vm536_vm4, %v532_v20  ;;  %v2979_v20 = vld [vmem:[#allocation8 + $0x60] sm:$0xff]  }
  0x78   : > { %2631 = vmatprep.mubr.msk.bf16.mxu0 %vm3266_vm0, %v3265_v0  ;;  %2616 = vmatpush3.bf16.msra.mxu0 %v2952_v22  ;;  %v2981_v22 = vld [vmem:[#allocation8 + $0x58] sm:$0xff]  }
  0x79   : > { %2617 = vmatprep.subr.bf16.mxu0 %v3265_v0  ;;  %2608 = vmatpush3.bf16.msra.mxu1 %v2961_v31 }
  0x7a   : > { %2609 = vmatprep.subr.bf16.mxu1 %v3265_v0 }
  0x7c   : > { %2618 = vmatpush3.bf16.msra.mxu0 %v2954_v24  ;;  %v2984_v24 = vld [vmem:[#allocation8 + $0x18] sm:$0xff]  }
  0x7d   : > { %2619 = vmatprep.subr.bf16.mxu0 %v3265_v0  ;;  %2610 = vmatpush3.bf16.msra.mxu1 %v2963_v33 }
  0x7e   : > { %2635 = vmatprep.subr.bf16.mxu1 %v3265_v0 }
  0x80   : > { %2620 = vmatpush3.bf16.msra.mxu0 %v2956_v26  ;;  %v2986_v26 = vld [vmem:[#allocation8 + $0x10] sm:$0xff]  }
  0x81   : > { %2621 = vmatprep.subr.bf16.mxu0 %v3265_v0 }
  0x84   : > { %2622 = vmatpush3.bf16.msra.mxu0 %v2958_v28  ;;  %v2988_v28 = vld [vmem:[#allocation8 + $0x8] sm:$0xff]  }
  0x85   : > { %2623 = vmatprep.subr.bf16.mxu0 %v3265_v0 }
  0x88   : > { %2624 = vmatpush3.bf16.msra.mxu0 %v2960_v30 }
  0x89   : > { %2625 = vmatprep.subr.bf16.mxu0 %v3265_v0 }
  0x8c   : > { %2626 = vmatpush3.bf16.msra.mxu0 %v2962_v32 }
  0x8d   : > { %2627 = vmatprep.subr.bf16.mxu0 %v3265_v0 }
  0x90   : > { %2628 = vmatpush3.bf16.msra.mxu0 %v2964_v34 }
  0x91   : > { %2629 = vmatprep.subr.bf16.mxu0 %v3265_v0 }
  0x94   : > { %2630 = vmatpush3.bf16.msra.mxu0 %v2965_v35 }
  0x95   : > { %2655 = vmatprep.subr.bf16.mxu0 %v3265_v0 }
 0x127   : > { %v578_v36 = vpop.f32.mrf.mxu0 }
 0x129   : > { %v2581_v37 = vpop.f32.mrf.mxu0 }
 0x12b   : > { %v581_v38 = vpop.f32.mrf.mxu0 }
 0x12d   : > { %v2582_v39 = vpop.f32.mrf.mxu0 }
 0x12f   : > { %v625_v40 = vpop.f32.mrf.mxu0 }
 0x130   : > { %v626_v44 = vadd.f32 %v625_v40, %v578_v36  ;;  %v2350_v40 = vld [vmem:[%s3756_s4] ss:$0 sm:$0xff] }
 0x131   : > { %v2587_v41 = vpop.f32.mrf.mxu0 }
 0x133   : > { %v628_v42 = vpop.f32.mrf.mxu0 }
 0x134   : > { %v629_v49 = vadd.f32 %v628_v42, %v581_v38 }
 0x135   : > { %v2588_v43 = vpop.f32.mrf.mxu0 }
 0x137   : > { %v674_v45 = vpop.f32.mrf.mxu0 }
 0x138   : > { %v681_v47 = vadd.f32 %v674_v45, %v626_v44 }
 0x139   : > { %v2593_v48 = vpop.f32.mrf.mxu0 }
 0x13a   : > { %v690_v50 = vadd.f32 %v2318_v46, %v681_v47 }
 0x13b   : > { %v677_v51 = vpop.f32.mrf.mxu0 }
 0x13c   : > { %v682_v52 = vadd.f32 %v677_v51, %v629_v49  ;;  %v3520_v54 = vmax.f32 %v690_v50, 0.0  ;;  %v2990_v51 = vld [vmem:[#allocation8 + $0xb8] sm:$0xff]  }
 0x13d   : > { %v2594_v53 = vpop.f32.mrf.mxu0 }
 0x13e   : > { %v691_v55 = vadd.f32 %v2318_v46, %v682_v52  ;;  %v696_v59 = vrot.slane %v3520_v54, 7  ;;  %v704_v9 = vrot.slane %v3520_v54, 1 }
 0x140   : > { %v3522_v56 = vmax.f32 %v691_v55, 0.0 }
 0x142   : > { %v697_v60 = vrot.slane %v3522_v56, 7  ;;  %v703_v61 = vpack.c.bf16 %v3522_v56, %v3520_v54  ;;  %v705_v8 = vrot.slane %v3522_v56, 1 }
 0x144   : > { %2612 = vmatmul.mubr.bf16.vlgmr.msra.gmra.mxu1 %v703_v61  ;;  %v698_v62 = vsel %vm516_vm2, %v696_v59, %v697_v60  ;;  %v706_v11 = vsel %vm525_vm3, %v704_v9, %v705_v8  ;;  %v2991_v60 = vld [vmem:[#allocation8 + $0xb0] sm:$0xff]   ;;  %v2992_v61 = vld [vmem:[#allocation8 + $0xa8] sm:$0xff]   ;;  %v2999_v9 = vld [vmem:[#allocation9 + $0x38] sm:$0xff]  }
 0x145   : > { %2636 = vmatpush3.bf16.msra.mxu1 %v2966_v57  ;;  %v2337_v1 = vpack.c.bf16 %v698_v62, %v696_v59  ;;  %2651 = vmatprep.mubr.msk.bf16.mxu1 %vm3266_vm0, %v3265_v0  ;;  %v2348_v13 = vpack.c.bf16 %v705_v8, %v706_v11  ;;  %v2993_v62 = vld [vmem:[#allocation8 + $0xa0] sm:$0xff]   ;;  %v2998_v8 = vld [vmem:[#allocation9 + $0x78] sm:$0xff]   ;;  %v3001_v11 = vld [vmem:[#allocation9 + $0x30] sm:$0xff]  }
 0x146   : > { %2637 = vmatprep.subr.bf16.mxu1 %v3265_v0 }
 0x147   : > { %2632 = vmatmul.mubr.msk.bf16.vlgmr.msra.gmra.mxu0 %vm3537_vm7, %v2337_v1  ;;  %v2994_v1 = vld [vmem:[#allocation8 + $0x98] sm:$0xff]  }
 0x148   : > { %2671 = vmatprep.mubr.msk.bf16.mxu0 %vm3266_vm0, %v3265_v0  ;;  %2656 = vmatpush3.bf16.msra.mxu0 %v2974_v14  ;;  %v3004_v14 = vld [vmem:[#allocation9 + $0x60] sm:$0xff]  }
 0x149   : > { %2638 = vmatpush3.bf16.msra.mxu1 %v2967_v2  ;;  %2657 = vmatprep.subr.bf16.mxu0 %v3265_v0  ;;  %v2995_v2 = vld [vmem:[#allocation8 + $0x90] sm:$0xff]  }
 0x14a   : > { %2639 = vmatprep.subr.bf16.mxu1 %v3265_v0 }
 0x14c   : > { %2658 = vmatpush3.bf16.msra.mxu0 %v2975_v16  ;;  %v3006_v16 = vld [vmem:[#allocation9 + $0x58] sm:$0xff]  }
 0x14d   : > { %2640 = vmatpush3.bf16.msra.mxu1 %v2968_v3  ;;  %2659 = vmatprep.subr.bf16.mxu0 %v3265_v0 }
 0x14e   : > { %2641 = vmatprep.subr.bf16.mxu1 %v3265_v0 }
 0x150   : > { %2660 = vmatpush3.bf16.msra.mxu0 %v2977_v18  ;;  %v3008_v18 = vld [vmem:[#allocation9 + $0x50] sm:$0xff]  }
 0x151   : > { %2642 = vmatpush3.bf16.msra.mxu1 %v2969_v4  ;;  %2661 = vmatprep.subr.bf16.mxu0 %v3265_v0 }
 0x152   : > { %2643 = vmatprep.subr.bf16.mxu1 %v3265_v0 }
 0x154   : > { %2662 = vmatpush3.bf16.msra.mxu0 %v2979_v20  ;;  %v3010_v20 = vld [vmem:[#allocation9 + $0x48] sm:$0xff]  }
 0x155   : > { %2644 = vmatpush3.bf16.msra.mxu1 %v2970_v5  ;;  %2663 = vmatprep.subr.bf16.mxu0 %v3265_v0  ;;  %v2997_v5 = vld [vmem:[#allocation8 + $0x80] sm:$0xff]  }
 0x156   : > { %2645 = vmatprep.subr.bf16.mxu1 %v3265_v0 }
 0x158   : > { %2664 = vmatpush3.bf16.msra.mxu0 %v2981_v22  ;;  %v3012_v22 = vld [vmem:[#allocation9 + $0x40] sm:$0xff]  }
 0x159   : > { %2646 = vmatpush3.bf16.msra.mxu1 %v2971_v6  ;;  %2665 = vmatprep.subr.bf16.mxu0 %v3265_v0 }
 0x15a   : > { %2647 = vmatprep.subr.bf16.mxu1 %v3265_v0 }
 0x15c   : > { %2666 = vmatpush3.bf16.msra.mxu0 %v2983_v23  ;;  %v3013_v23 = vld [vmem:[#allocation9] sm:$0xff]  }
 0x15d   : > { %2648 = vmatpush3.bf16.msra.mxu1 %v2972_v7  ;;  %2667 = vmatprep.subr.bf16.mxu0 %v3265_v0 }
 0x15e   : > { %2649 = vmatprep.subr.bf16.mxu1 %v3265_v0 }
 0x160   : > { %2668 = vmatpush3.bf16.msra.mxu0 %v2985_v25 }
 0x161   : > { %2650 = vmatpush3.bf16.msra.mxu1 %v2973_v10  ;;  %2669 = vmatprep.subr.bf16.mxu0 %v3265_v0  ;;  %v3000_v10 = vld [vmem:[#allocation9 + $0x70] sm:$0xff]  }
 0x162   : > { %2675 = vmatprep.subr.bf16.mxu1 %v3265_v0 }
 0x164   : > { %2652 = vmatmul.mubr.msk.bf16.vlgmr.msra.gmra.mxu1 %vm3559_vm8, %v2348_v13  ;;  %2670 = vmatpush3.bf16.msra.mxu0 %v2987_v27  ;;  %v3002_v13 = vld [vmem:[#allocation9 + $0x68] sm:$0xff]  }
 0x165   : > { %2691 = vmatprep.mubr.msk.bf16.mxu1 %vm3266_vm0, %v3265_v0  ;;  %2676 = vmatpush3.bf16.msra.mxu1 %v2976_v15  ;;  %v3005_v15 = vld [vmem:[#allocation9 + $0x20] sm:$0xff]  }
 0x166   : > { %2677 = vmatprep.subr.bf16.mxu1 %v3265_v0  ;;  %2695 = vmatprep.subr.bf16.mxu0 %v3265_v0 }
 0x169   : > { %2678 = vmatpush3.bf16.msra.mxu1 %v2978_v17  ;;  %v3007_v17 = vld [vmem:[#allocation9 + $0x18] sm:$0xff]  }
 0x16a   : > { %2679 = vmatprep.subr.bf16.mxu1 %v3265_v0 }
 0x16d   : > { %2680 = vmatpush3.bf16.msra.mxu1 %v2980_v19  ;;  %v3009_v19 = vld [vmem:[#allocation9 + $0x10] sm:$0xff]  }
 0x16e   : > { %2681 = vmatprep.subr.bf16.mxu1 %v3265_v0 }
 0x171   : > { %2682 = vmatpush3.bf16.msra.mxu1 %v2982_v21  ;;  %v3011_v21 = vld [vmem:[#allocation9 + $0x8] sm:$0xff]  }
 0x172   : > { %2683 = vmatprep.subr.bf16.mxu1 %v3265_v0 }
 0x175   : > { %2684 = vmatpush3.bf16.msra.mxu1 %v2984_v24 }
 0x176   : > { %2685 = vmatprep.subr.bf16.mxu1 %v3265_v0 }
 0x179   : > { %2686 = vmatpush3.bf16.msra.mxu1 %v2986_v26 }
 0x17a   : > { %2687 = vmatprep.subr.bf16.mxu1 %v3265_v0 }
 0x17d   : > { %2688 = vmatpush3.bf16.msra.mxu1 %v2988_v28 }
 0x17e   : > { %2689 = vmatprep.subr.bf16.mxu1 %v3265_v0 }
 0x181   : > { %2690 = vmatpush3.bf16.msra.mxu1 %v2989_v29 }
 0x182   : > { %2715 = vmatprep.subr.bf16.mxu1 %v3265_v0 }
 0x204   : > { %v826_v30 = vpop.f32.mrf.mxu1 }
 0x206   : > { %v2613_v31 = vpop.f32.mrf.mxu1 }
 0x207   : > { %v915_v32 = vpop.f32.mrf.mxu0 }
 0x208   : > { %v829_v33 = vpop.f32.mrf.mxu1  ;;  %v916_v38 = vadd.f32 %v915_v32, %v826_v30 }
 0x209   : > { %v2633_v34 = vpop.f32.mrf.mxu0 }
 0x20a   : > { %v2614_v35 = vpop.f32.mrf.mxu1  ;;  %v2382_v34 = vld [vmem:[%s3758_s6] ss:$0 sm:$0xff] }
 0x20b   : > { %v918_v36 = vpop.f32.mrf.mxu0 }
 0x20c   : > { %v919_v43 = vadd.f32 %v918_v36, %v829_v33 }
 0x20d   : > { %v2634_v37 = vpop.f32.mrf.mxu0 }
 0x224   : > { %v1021_v39 = vpop.f32.mrf.mxu1 }
 0x225   : > { %v1028_v41 = vadd.f32 %v1021_v39, %v916_v38 }
 0x226   : > { %v2653_v42 = vpop.f32.mrf.mxu1 }
 0x227   : > { %v1037_v44 = vadd.f32 %v2350_v40, %v1028_v41 }
 0x228   : > { %v1024_v45 = vpop.f32.mrf.mxu1 }
 0x229   : > { %v1029_v46 = vadd.f32 %v1024_v45, %v919_v43  ;;  %v1039_v48 = vmax.f32 %v1037_v44, 0.0 }
 0x22a   : > { %v2654_v47 = vpop.f32.mrf.mxu1 }
 0x22b   : > { %v1038_v49 = vadd.f32 %v2350_v40, %v1029_v46  ;;  %v1043_v52 = vrot.slane %v1039_v48, 7  ;;  %v1051_v4 = vrot.slane %v1039_v48, 1 }
 0x22d   : > { %v1040_v50 = vmax.f32 %v1038_v49, 0.0  ;;  %v3014_v49 = vld [vmem:[#allocation9 + $0xb8] sm:$0xff]  }
 0x22f   : > { %v1044_v53 = vrot.slane %v1040_v50, 7  ;;  %v1050_v55 = vpack.c.bf16 %v1040_v50, %v1039_v48  ;;  %v1052_v3 = vrot.slane %v1040_v50, 1 }
 0x231   : > { %v1045_v57 = vsel %vm516_vm2, %v1043_v52, %v1044_v53  ;;  %2672 = vmatmul.mubr.bf16.vlgmr.msra.gmra.mxu0 %v1050_v55  ;;  %v1053_v6 = vsel %vm525_vm3, %v1051_v4, %v1052_v3  ;;  %v3018_v53 = vld [vmem:[#allocation9 + $0x98] sm:$0xff]   ;;  %v3019_v55 = vld [vmem:[#allocation9 + $0x90] sm:$0xff]   ;;  %v3027_v4 = vld [vmem:[#allocation11 + $0x28] sm:$0xff]  }
 0x232   : > { %2696 = vmatpush3.bf16.msra.mxu0 %v2990_v51  ;;  %v2369_v59 = vpack.c.bf16 %v1045_v57, %v1043_v52  ;;  %2711 = vmatprep.mubr.msk.bf16.mxu0 %vm3266_vm0, %v3265_v0  ;;  %v2380_v7 = vpack.c.bf16 %v1052_v3, %v1053_v6  ;;  %v3017_v52 = vld [vmem:[#allocation9 + $0xa0] sm:$0xff]   ;;  %v3020_v57 = vld [vmem:[#allocation9 + $0x88] sm:$0xff]  }
 0x233   : > { %2697 = vmatprep.subr.bf16.mxu0 %v3265_v0  ;;  %v3026_v3 = vld [vmem:[#allocation11 + $0x68] sm:$0xff]   ;;  %v3029_v6 = vld [vmem:[#allocation11 + $0x20] sm:$0xff]  }
 0x234   : > { %2692 = vmatmul.mubr.msk.bf16.vlgmr.msra.gmra.mxu1 %vm3537_vm7, %v2369_v59  ;;  %v3021_v59 = vld [vmem:[#allocation9 + $0x80] sm:$0xff]  }
 0x235   : > { %2731 = vmatprep.mubr.msk.bf16.mxu1 %vm3266_vm0, %v3265_v0  ;;  %2716 = vmatpush3.bf16.msra.mxu1 %v2998_v8  ;;  %v3031_v8 = vld [vmem:[#allocation11 + $0x18] sm:$0xff]  }
 0x236   : > { %2698 = vmatpush3.bf16.msra.mxu0 %v2991_v60  ;;  %2717 = vmatprep.subr.bf16.mxu1 %v3265_v0 }
 0x237   : > { %2699 = vmatprep.subr.bf16.mxu0 %v3265_v0 }
 0x239   : > { %2718 = vmatpush3.bf16.msra.mxu1 %v3000_v10  ;;  %v3033_v10 = vld [vmem:[#allocation11 + $0x10] sm:$0xff]  }
 0x23a   : > { %2700 = vmatpush3.bf16.msra.mxu0 %v2992_v61  ;;  %2719 = vmatprep.subr.bf16.mxu1 %v3265_v0 }
 0x23b   : > { %2701 = vmatprep.subr.bf16.mxu0 %v3265_v0 }
 0x23d   : > { %2720 = vmatpush3.bf16.msra.mxu1 %v3002_v13  ;;  %v3035_v13 = vld [vmem:[#allocation11 + $0x8] sm:$0xff]  }
 0x23e   : > { %2702 = vmatpush3.bf16.msra.mxu0 %v2993_v62  ;;  %2721 = vmatprep.subr.bf16.mxu1 %v3265_v0  ;;  %v3022_v62 = vld [vmem:[#allocation11 + $0x78] sm:$0xff]  }
 0x23f   : > { %2703 = vmatprep.subr.bf16.mxu0 %v3265_v0 }
 0x241   : > { %2722 = vmatpush3.bf16.msra.mxu1 %v3004_v14  ;;  %v3037_v14 = vld [vmem:[#allocation11] sm:$0xff]  }
 0x242   : > { %2704 = vmatpush3.bf16.msra.mxu0 %v2994_v1  ;;  %2723 = vmatprep.subr.bf16.mxu1 %v3265_v0  ;;  %v3023_v1 = vld [vmem:[#allocation11 + $0x38] sm:$0xff]  }
 0x243   : > { %2705 = vmatprep.subr.bf16.mxu0 %v3265_v0 }
 0x245   : > { %2724 = vmatpush3.bf16.msra.mxu1 %v3006_v16 }
 0x246   : > { %2706 = vmatpush3.bf16.msra.mxu0 %v2995_v2  ;;  %2725 = vmatprep.subr.bf16.mxu1 %v3265_v0  ;;  %v3024_v2 = vld [vmem:[#allocation11 + $0x70] sm:$0xff]  }
 0x247   : > { %2707 = vmatprep.subr.bf16.mxu0 %v3265_v0 }
 0x249   : > { %2726 = vmatpush3.bf16.msra.mxu1 %v3008_v18 }
 0x24a   : > { %2708 = vmatpush3.bf16.msra.mxu0 %v2996_v63  ;;  %2727 = vmatprep.subr.bf16.mxu1 %v3265_v0  ;;  %v3025_v63 = vld [vmem:[#allocation11 + $0x30] sm:$0xff]  }
 0x24b   : > { %2709 = vmatprep.subr.bf16.mxu0 %v3265_v0 }
 0x24d   : > { %2728 = vmatpush3.bf16.msra.mxu1 %v3010_v20 }
 0x24e   : > { %2710 = vmatpush3.bf16.msra.mxu0 %v2997_v5  ;;  %2729 = vmatprep.subr.bf16.mxu1 %v3265_v0  ;;  %v3028_v5 = vld [vmem:[#allocation11 + $0x60] sm:$0xff]  }
 0x24f   : > { %2735 = vmatprep.subr.bf16.mxu0 %v3265_v0 }
 0x251   : > { %2712 = vmatmul.mubr.msk.bf16.vlgmr.msra.gmra.mxu0 %vm3559_vm8, %v2380_v7  ;;  %2730 = vmatpush3.bf16.msra.mxu1 %v3012_v22  ;;  %v3030_v7 = vld [vmem:[#allocation11 + $0x58] sm:$0xff]  }
 0x252   : > { %2751 = vmatprep.mubr.msk.bf16.mxu0 %vm3266_vm0, %v3265_v0  ;;  %2736 = vmatpush3.bf16.msra.mxu0 %v2999_v9  ;;  %v3032_v9 = vld [vmem:[#allocation11 + $0x50] sm:$0xff]  }
 0x253   : > { %2737 = vmatprep.subr.bf16.mxu0 %v3265_v0  ;;  %2755 = vmatprep.subr.bf16.mxu1 %v3265_v0 }
 0x256   : > { %2738 = vmatpush3.bf16.msra.mxu0 %v3001_v11  ;;  %v3034_v11 = vld [vmem:[#allocation11 + $0x48] sm:$0xff]  }
 0x257   : > { %2739 = vmatprep.subr.bf16.mxu0 %v3265_v0 }
 0x25a   : > { %2740 = vmatpush3.bf16.msra.mxu0 %v3003_v12  ;;  %v3036_v12 = vld [vmem:[#allocation11 + $0x40] sm:$0xff]  }
 0x25b   : > { %2741 = vmatprep.subr.bf16.mxu0 %v3265_v0 }
 0x25e   : > { %2742 = vmatpush3.bf16.msra.mxu0 %v3005_v15 }
 0x25f   : > { %2743 = vmatprep.subr.bf16.mxu0 %v3265_v0 }
 0x262   : > { %2744 = vmatpush3.bf16.msra.mxu0 %v3007_v17 }
 0x263   : > { %2745 = vmatprep.subr.bf16.mxu0 %v3265_v0 }
 0x266   : > { %2746 = vmatpush3.bf16.msra.mxu0 %v3009_v19 }
 0x267   : > { %2747 = vmatprep.subr.bf16.mxu0 %v3265_v0 }
 0x26a   : > { %2748 = vmatpush3.bf16.msra.mxu0 %v3011_v21 }
 0x26b   : > { %2749 = vmatprep.subr.bf16.mxu0 %v3265_v0 }
 0x26e   : > { %2750 = vmatpush3.bf16.msra.mxu0 %v3013_v23 }
 0x26f   : > { %2775 = vmatprep.subr.bf16.mxu0 %v3265_v0 }
 0x2f1   : > { %v1173_v24 = vpop.f32.mrf.mxu0 }
 0x2f3   : > { %v2673_v25 = vpop.f32.mrf.mxu0 }
 0x2f4   : > { %v1262_v26 = vpop.f32.mrf.mxu1  ;;  %v2407_v25 = vld [vmem:[%s3760_s8] ss:$0 sm:$0xff] }
 0x2f5   : > { %v1176_v27 = vpop.f32.mrf.mxu0  ;;  %v1263_v32 = vadd.f32 %v1262_v26, %v1173_v24 }
 0x2f6   : > { %v2693_v28 = vpop.f32.mrf.mxu1 }
 0x2f7   : > { %v2674_v29 = vpop.f32.mrf.mxu0 }
 0x2f8   : > { %v1265_v30 = vpop.f32.mrf.mxu1 }
 0x2f9   : > { %v1266_v37 = vadd.f32 %v1265_v30, %v1176_v27 }
 0x2fa   : > { %v2694_v31 = vpop.f32.mrf.mxu1 }
 0x311   : > { %v1368_v33 = vpop.f32.mrf.mxu0 }
 0x312   : > { %v1375_v35 = vadd.f32 %v1368_v33, %v1263_v32  ;;  %v3038_v32 = vld [vmem:[#allocation11 + $0xb8] sm:$0xff]  }
 0x313   : > { %v2713_v36 = vpop.f32.mrf.mxu0 }
 0x314   : > { %v1384_v38 = vadd.f32 %v2382_v34, %v1375_v35  ;;  %v3039_v35 = vld [vmem:[%s3763_s11 + $0x38] sm:$0xff]  }
 0x315   : > { %v1371_v39 = vpop.f32.mrf.mxu0 }
 0x316   : > { %v1386_v40 = vadd.f32 %v1384_v38, %v3520_v54  ;;  %v1376_v41 = vadd.f32 %v1371_v39, %v1266_v37  ;;  %v3015_v54 = vld [vmem:[#allocation9 + $0xb0] sm:$0xff]   ;;  %v3042_v38 = vld [vmem:[#allocation11 + $0xa8] sm:$0xff]  }
 0x317   : > { %v2714_v42 = vpop.f32.mrf.mxu0  ;;  %v3040_v37 = vld [vmem:[#allocation11 + $0xb0] sm:$0xff]   ;;  %v3043_v39 = vld [vmem:[%s3763_s11 + $0x28] sm:$0xff]  }
 0x318   : > { %v1388_v43 = vmax.f32 %v1386_v40, 0.0  ;;  %v1385_v44 = vadd.f32 %v2382_v34, %v1376_v41  ;;  %v3044_v40 = vld [vmem:[#allocation11 + $0xa0] sm:$0xff]   ;;  %v3046_v42 = vld [vmem:[#allocation11 + $0x98] sm:$0xff]  }
 0x319   : > { %v3045_v41 = vld [vmem:[%s3763_s11 + $0x20] sm:$0xff]  }
 0x31a   : > { %1392 = vst [vmem:[#allocation2 + $0x1] sm:$0xff] %v1388_v43  ;;  %v1387_v45 = vadd.f32 %v1385_v44, %v3522_v56  ;;  %v3016_v56 = vld [vmem:[#allocation9 + $0xa8] sm:$0xff]   ;;  %v3047_v43 = vld [vmem:[%s3763_s11 + $0x18] sm:$0xff]  }
 0x31b   : > { %v3048_v44 = vld [vmem:[#allocation11 + $0x90] sm:$0xff]  }
 0x31c   : > { %v1389_v46 = vmax.f32 %v1387_v45, 0.0  ;;  %v3049_v45 = vld [vmem:[%s3763_s11 + $0x10] sm:$0xff]  }
 0x31e   : > { %1393 = vst [vmem:[#allocation2 + $0x9] sm:$0xff] %v1389_v46  ;;  %v3050_v46 = vld [vmem:[#allocation11 + $0x88] sm:$0xff]  }
 0x325   : > { %v1397_v47 = vld [vmem:[#allocation2 + $0x1] ss:$2 sm:$0xff]  ;;  %v1394_v48 = vld [vmem:[#allocation2] ss:$2 sm:$0xff] }
 0x326   : > { %v3628_v50 = vpack.c.bf16 %v1397_v47, %v1397_v47  ;;  %v1395_v51 = vpack.c.bf16 %v1394_v48, %v1394_v48  ;;  %v1400_v60 = vld [vmem:[#allocation2 + $0x2] ss:$2 sm:$0xff] }
 0x327   : > { %v1401_v61 = vpack.c.bf16 %v1400_v60, %v1400_v60  ;;  %v3051_v47 = vld [vmem:[%s3763_s11 + $0x8] sm:$0xff]  }
 0x328   : > { %2732 = vmatmul.mubr.bf16.vlgmr.msra.gmra.mxu1 %v3628_v50  ;;  %2752 = vmatmul.mubr.bf16.vlgmr.msra.gmra.mxu0 %v1395_v51  ;;  %v3052_v48 = vld [vmem:[#allocation11 + $0x80] sm:$0xff]  }
 0x329   : > { %2756 = vmatpush3.bf16.msra.mxu1 %v3014_v49  ;;  %2771 = vmatprep.mubr.msk.bf16.mxu1 %vm3266_vm0, %v3265_v0  ;;  %v3053_v51 = vld [vmem:[%s3763_s11] sm:$0xff]  }
 0x32a   : > { %2757 = vmatprep.subr.bf16.mxu1 %v3265_v0  ;;  %2791 = vmatprep.mubr.msk.bf16.mxu0 %vm3266_vm0, %v3265_v0 }
 0x32b   : > { %2776 = vmatpush3.bf16.msra.mxu0 %v3022_v62 }
 0x32c   : > { %2777 = vmatprep.subr.bf16.mxu0 %v3265_v0 }
 0x32d   : > { %2758 = vmatpush3.bf16.msra.mxu1 %v3015_v54 }
 0x32e   : > { %2759 = vmatprep.subr.bf16.mxu1 %v3265_v0 }
 0x32f   : > { %2778 = vmatpush3.bf16.msra.mxu0 %v3024_v2  ;;  %v2441_v2 = vld [vmem:[%s3764_s12] ss:$0 sm:$0xff] }
 0x330   : > { %2779 = vmatprep.subr.bf16.mxu0 %v3265_v0 }
 0x331   : > { %2760 = vmatpush3.bf16.msra.mxu1 %v3016_v56 }
 0x332   : > { %2761 = vmatprep.subr.bf16.mxu1 %v3265_v0 }
 0x333   : > { %2780 = vmatpush3.bf16.msra.mxu0 %v3026_v3 }
 0x334   : > { %2781 = vmatprep.subr.bf16.mxu0 %v3265_v0 }
 0x335   : > { %2762 = vmatpush3.bf16.msra.mxu1 %v3017_v52 }
 0x336   : > { %2763 = vmatprep.subr.bf16.mxu1 %v3265_v0 }
 0x337   : > { %2782 = vmatpush3.bf16.msra.mxu0 %v3028_v5 }
 0x338   : > { %2783 = vmatprep.subr.bf16.mxu0 %v3265_v0 }
 0x339   : > { %2764 = vmatpush3.bf16.msra.mxu1 %v3018_v53 }
 0x33a   : > { %2765 = vmatprep.subr.bf16.mxu1 %v3265_v0 }
 0x33b   : > { %2784 = vmatpush3.bf16.msra.mxu0 %v3030_v7 }
 0x33c   : > { %2785 = vmatprep.subr.bf16.mxu0 %v3265_v0 }
 0x33d   : > { %2766 = vmatpush3.bf16.msra.mxu1 %v3019_v55 }
 0x33e   : > { %2767 = vmatprep.subr.bf16.mxu1 %v3265_v0 }
 0x33f   : > { %2786 = vmatpush3.bf16.msra.mxu0 %v3032_v9 }
 0x340   : > { %2787 = vmatprep.subr.bf16.mxu0 %v3265_v0 }
 0x341   : > { %2768 = vmatpush3.bf16.msra.mxu1 %v3020_v57 }
 0x342   : > { %2769 = vmatprep.subr.bf16.mxu1 %v3265_v0 }
 0x343   : > { %2788 = vmatpush3.bf16.msra.mxu0 %v3034_v11 }
 0x344   : > { %2789 = vmatprep.subr.bf16.mxu0 %v3265_v0 }
 0x345   : > { %2770 = vmatpush3.bf16.msra.mxu1 %v3021_v59 }
 0x346   : > { %2795 = vmatprep.subr.bf16.mxu1 %v3265_v0 }
 0x347   : > { %2790 = vmatpush3.bf16.msra.mxu0 %v3036_v12 }
 0x348   : > { %2772 = vmatmul.mubr.bf16.vlgmr.msra.gmra.mxu1 %v1401_v61  ;;  %2815 = vmatprep.subr.bf16.mxu0 %v3265_v0 }
 0x349   : > { %2811 = vmatprep.mubr.msk.bf16.mxu1 %vm3266_vm0, %v3265_v0  ;;  %2796 = vmatpush3.bf16.msra.mxu1 %v3023_v1 }
 0x34a   : > { %2797 = vmatprep.subr.bf16.mxu1 %v3265_v0 }
 0x34d   : > { %2798 = vmatpush3.bf16.msra.mxu1 %v3025_v63 }
 0x34e   : > { %2799 = vmatprep.subr.bf16.mxu1 %v3265_v0 }
 0x351   : > { %2800 = vmatpush3.bf16.msra.mxu1 %v3027_v4 }
 0x352   : > { %2801 = vmatprep.subr.bf16.mxu1 %v3265_v0 }
 0x355   : > { %2802 = vmatpush3.bf16.msra.mxu1 %v3029_v6 }
 0x356   : > { %2803 = vmatprep.subr.bf16.mxu1 %v3265_v0 }
 0x359   : > { %2804 = vmatpush3.bf16.msra.mxu1 %v3031_v8 }
 0x35a   : > { %2805 = vmatprep.subr.bf16.mxu1 %v3265_v0 }
 0x35d   : > { %2806 = vmatpush3.bf16.msra.mxu1 %v3033_v10 }
 0x35e   : > { %2807 = vmatprep.subr.bf16.mxu1 %v3265_v0 }
 0x361   : > { %2808 = vmatpush3.bf16.msra.mxu1 %v3035_v13 }
 0x362   : > { %2809 = vmatprep.subr.bf16.mxu1 %v3265_v0 }
 0x365   : > { %2810 = vmatpush3.bf16.msra.mxu1 %v3037_v14 }
 0x366   : > { %2835 = vmatprep.subr.bf16.mxu1 %v3265_v0 }
 0x3e8   : > { %v1517_v15 = vpop.f32.mrf.mxu1  ;;  %v1605_v16 = vpop.f32.mrf.mxu0 }
 0x3e9   : > { %v1606_v23 = vadd.f32 %v1605_v16, %v1517_v15 }
 0x3ea   : > { %v2733_v17 = vpop.f32.mrf.mxu1  ;;  %v2753_v18 = vpop.f32.mrf.mxu0 }
 0x3ec   : > { %v1520_v19 = vpop.f32.mrf.mxu1  ;;  %v1608_v20 = vpop.f32.mrf.mxu0 }
 0x3ee   : > { %v2734_v21 = vpop.f32.mrf.mxu1  ;;  %v2754_v22 = vpop.f32.mrf.mxu0 }
 0x408   : > { %v1710_v24 = vpop.f32.mrf.mxu1 }
 0x409   : > { %v1716_v26 = vadd.f32 %v1710_v24, %v1606_v23 }
 0x40a   : > { %v2773_v27 = vpop.f32.mrf.mxu1 }
 0x40b   : > { %v1724_v28 = vadd.f32 %v2407_v25, %v1716_v26 }
 0x40c   : > { %v1713_v29 = vpop.f32.mrf.mxu1 }
 0x40d   : > { %v1725_v30 = vmax.f32 %v1724_v28, 0.0 }
 0x40e   : > { %v2774_v31 = vpop.f32.mrf.mxu1 }
 0x40f   : > { %v1727_v33 = vrot.slane %v1725_v30, 7  ;;  %v1731_v34 = vpack.c.bf16 %v1725_v30, %v1725_v30  ;;  %v1732_v49 = vrot.slane %v1725_v30, 1 }
 0x411   : > { %v2427_v36 = vpack.c.bf16 %v1727_v33, %v1727_v33  ;;  %2792 = vmatmul.mubr.bf16.vlgmr.msra.gmra.mxu0 %v1731_v34  ;;  %v2438_v54 = vpack.c.bf16 %v1732_v49, %v1732_v49 }
 0x412   : > { %2816 = vmatpush3.bf16.msra.mxu0 %v3038_v32  ;;  %2831 = vmatprep.mubr.msk.bf16.mxu0 %vm3266_vm0, %v3265_v0 }
 0x413   : > { %2812 = vmatmul.mubr.msk.bf16.vlgmr.msra.gmra.mxu1 %vm2426_vm9, %v2427_v36  ;;  %2817 = vmatprep.subr.bf16.mxu0 %v3265_v0 }
 0x414   : > { %2836 = vmatpush3.bf16.msra.mxu1 %v3039_v35  ;;  %2851 = vmatprep.mubr.msk.bf16.mxu1 %vm3266_vm0, %v3265_v0 }
 0x415   : > { %2837 = vmatprep.subr.bf16.mxu1 %v3265_v0 }
 0x416   : > { %2818 = vmatpush3.bf16.msra.mxu0 %v3040_v37 }
 0x417   : > { %2819 = vmatprep.subr.bf16.mxu0 %v3265_v0 }
 0x418   : > { %2838 = vmatpush3.bf16.msra.mxu1 %v3041_v58 }
 0x419   : > { %2839 = vmatprep.subr.bf16.mxu1 %v3265_v0 }
 0x41a   : > { %2820 = vmatpush3.bf16.msra.mxu0 %v3042_v38 }
 0x41b   : > { %2821 = vmatprep.subr.bf16.mxu0 %v3265_v0 }
 0x41c   : > { %2840 = vmatpush3.bf16.msra.mxu1 %v3043_v39 }
 0x41d   : > { %2841 = vmatprep.subr.bf16.mxu1 %v3265_v0 }
 0x41e   : > { %2822 = vmatpush3.bf16.msra.mxu0 %v3044_v40 }
 0x41f   : > { %2823 = vmatprep.subr.bf16.mxu0 %v3265_v0 }
 0x420   : > { %2842 = vmatpush3.bf16.msra.mxu1 %v3045_v41 }
 0x421   : > { %2843 = vmatprep.subr.bf16.mxu1 %v3265_v0 }
 0x422   : > { %2824 = vmatpush3.bf16.msra.mxu0 %v3046_v42 }
 0x423   : > { %2825 = vmatprep.subr.bf16.mxu0 %v3265_v0 }
 0x424   : > { %2844 = vmatpush3.bf16.msra.mxu1 %v3047_v43 }
 0x425   : > { %2845 = vmatprep.subr.bf16.mxu1 %v3265_v0 }
 0x426   : > { %2826 = vmatpush3.bf16.msra.mxu0 %v3048_v44 }
 0x427   : > { %2827 = vmatprep.subr.bf16.mxu0 %v3265_v0 }
 0x428   : > { %2846 = vmatpush3.bf16.msra.mxu1 %v3049_v45 }
 0x429   : > { %2847 = vmatprep.subr.bf16.mxu1 %v3265_v0 }
 0x42a   : > { %2828 = vmatpush3.bf16.msra.mxu0 %v3050_v46 }
 0x42b   : > { %2829 = vmatprep.subr.bf16.mxu0 %v3265_v0 }
 0x42c   : > { %2848 = vmatpush3.bf16.msra.mxu1 %v3051_v47 }
 0x42d   : > { %2849 = vmatprep.subr.bf16.mxu1 %v3265_v0  ;;  %v2440_v0 = vld [vmem:[%s3762_s10] ss:$0 sm:$0xff] }
 0x42e   : > { %2830 = vmatpush3.bf16.msra.mxu0 %v3052_v48 }
 0x430   : > { %2850 = vmatpush3.bf16.msra.mxu1 %v3053_v51 }
 0x431   : > { %2832 = vmatmul.mubr.msk.bf16.vlgmr.msra.gmra.mxu0 %vm2437_vm10, %v2438_v54 }
 0x433   : > { %2852 = vmatmul.mubr.bf16.vlgmr.msra.gmra.mxu1 %v3628_v50 }
 0x4d1   : > { %v1851_v56 = vpop.f32.mrf.mxu0 }
 0x4d3   : > { %v2793_v52 = vpop.f32.mrf.mxu0  ;;  %v1939_v53 = vpop.f32.mrf.mxu1 }
 0x4d4   : > { %v1940_v62 = vadd.f32 %v1939_v53, %v1851_v56 }
 0x4d5   : > { %v1854_v55 = vpop.f32.mrf.mxu0  ;;  %v2813_v57 = vpop.f32.mrf.mxu1 }
 0x4d7   : > { %v2794_v59 = vpop.f32.mrf.mxu0  ;;  %v1942_v60 = vpop.f32.mrf.mxu1 }
 0x4d9   : > { %v2814_v61 = vpop.f32.mrf.mxu1 }
 0x4f1   : > { %v2044_v1 = vpop.f32.mrf.mxu0 }
 0x4f2   : > { %v2050_v50 = vadd.f32 %v2044_v1, %v1940_v62 }
 0x4f3   : > { %v2833_v63 = vpop.f32.mrf.mxu0  ;;  %v2164_v3 = vpop.f32.mrf.mxu1 }
 0x4f4   : > { %v2058_v4 = vadd.f32 %v2440_v0, %v2050_v50  ;;  %v2165_v5 = vadd.f32 %v2441_v2, %v2164_v3 }
 0x4f5   : > { %v2047_v6 = vpop.f32.mrf.mxu0  ;;  %v2853_v7 = vpop.f32.mrf.mxu1 }
 0x4f6   : > { %v2170_v8 = vadd.f32 %v2165_v5, %v2058_v4 }
 0x4f7   : > { %v2834_v9 = vpop.f32.mrf.mxu0  ;;  %v2167_v10 = vpop.f32.mrf.mxu1 }
 0x4f8   : > { %v2171_v11 = vmax.f32 %v2170_v8, 0.0 }
 0x4f9   : > { %v2854_v13 = vpop.f32.mrf.mxu1 }
 0x4fa   : > { %v2172_v12 = vrot.slane %v2171_v11, 4 }
 0x4fc   : > { %v2173_v14 = vadd.f32 %v2172_v12, %v2171_v11 }
 0x4fe   : > { %v2174_v15 = vrot.slane %v2173_v14, 2 }
 0x500   : > { %v2175_v16 = vadd.f32 %v2174_v15, %v2173_v14 }
 0x502   : > { %v2176_v17 = vrot.slane %v2175_v16, 1 }
 0x504   : > { %v2177_v18 = vadd.f32 %v2176_v17, %v2175_v16 }
 0x506   : > { %v2179_v19 = vmul.f32 0.125, %v2177_v18 }
 0x508   : > { %2180 = vst [vmem:[%s505_s15] sm:$0x1] %v2179_v19 }
 0x509   : > { %3197 = shalt.err (!%p3194_p0)
}
 0x50a   : > { %s3198_s23 = scalar_lea.hbm %s2192_s19, 16  ;;  %s3202_s22 = scalar_lea.hbm %s3765_s13, 32 }
 0x50b   : > { %p3199_p3 = scmp.ne.s32.totalorder %s2192_s19, %s3198_s23  ;;  %p3203_p12 = scmp.lt.s32.totalorder %s2192_s19, %s3765_s13 }
 0x50c   : > { %p3204_p10 = scmp.lt.s32.totalorder %s3202_s22, %s3198_s23 }
 0x50d   : > { %p3200_p1 = pnand %p3199_p3, %p3377_p5 }
 0x50e   : > { %p3205_p4 = por %p3204_p10, %p3203_p12 }
 0x50f   : > { %p3201_p2 = pneg %p3200_p1 }
 0x511   : > { %p3206_p9 = pnand %p3205_p4, %p3201_p2 }
 0x513   : > { %3209 = shalt.err (!%p3206_p9)
}
 0x514   : > { %2875 = dma.vmem_to_hbm [thread:$0]  (%p3377_p5), %s2195_s27, 16, %s2192_s19, %s2182_s3  }
 0x515 PF: > { %s3796_s16 = sld [smem:[#allocation17_spill]]  ;;  %p2907_p8 = scmp.ge.s32.totalorder %s3256_s28, 2 }
 0x517   : > { %p2894_p7 = pnand %p2907_p8, %p3381_p6 }
 0x519   : > { %p2895_p11 = pneg %p2894_p7 }
 0x51b   : > { %s2206_s25 = sand.u32 1, %s3796_s16  }
 0x51c   : > { %s2207_s17 = scalar_lea.sflag [#allocation5], %s2206_s25 }
 0x51d   : > { %3239 = dma.done.wait (%p2895_p11), %s2207_s17, 16  }
 0x51e   : > { %3241 = vsyncadd (%p2895_p11), %s2207_s17, 4294967280  ;;  %s3798_s28 = sld [smem:[#allocation19_spill]]  ;;  %s3801_s25 = smov %s3248_s26 }
 0x51f   : > { %s3799_s20 = sld [smem:[#allocation18_spill]] }
 0x520   : > { %s3800_s27 = sld [smem:[#allocation20_spill]] }
 0x524   : > { %p26_p13 = scmp.ge.s32.totalorder %s3798_s28, 4  }
 0x525   : > { %s3802_s26 = smov %s3799_s20 }
 0x526   :  { %28 = sbr.rel (!%p26_p13) target bundleno = 8 (0x8), region = 140 }
 0x52b   :  { %2211 = vsyncpa [#allocation4], 1 }
 0x52c   :  { %2213 = vsyncpa [#allocation4 + $0x1], 1 }
 0x52d   :  { %2214 = vsyncpa [#allocation7], 1 }
 0x52e   :  { %2215 = vsyncpa [#allocation10], 1 }
 0x52f   :  { %2216 = vsyncpa [#allocation5], 1 }
 0x530   :  { %2218 = vsyncpa [#allocation5 + $0x1], 1 }

</bundles_post_ra>
